<compile_context>
chip_gen: v7x
topology: tpu7x:2x2x1
jax: 0.10.0
libtpu: 0.0.40
codegen_flags: <defaults>
</compile_context>

<pallas_src>
import functools

import numpy as np
import jax
import jax.numpy as jnp
from jax import lax
from jax.experimental import pallas as pl
from jax.experimental.pallas import tpu as pltpu

NEG_INF = -1e30

# Order of the fused / preprocessed parameters as passed to the kernel.
KERNEL_ARG_ORDER = (
    "ai_w", "ai_b",            # atom input projection
    "node_w",                  # per-layer fused (H, 5H): [a_dst | m_dst | a_src | m_src | wgt]
    "edge_w",                  # per-layer fused (edge_in, 2H): [a_edge | m_edge]
    "gm_bias",                 # per-layer (1, 2H): folded attn / msg biases
    "adot_row", "adot_b",      # per-layer attention dot vector (1, H) and bias (1, 1)
    "wgt_b",                   # per-layer wgt_n bias (1, H)
    "ao_wn", "ao_wh", "ao_b",  # atom_out split over concat([node_feats, atom_h])
    "ip_wh", "ip_wn", "ip_b",  # readout in_project split over concat([gnn_out, node_feats])
    "op_w", "op_b",            # readout out_project
)


def _round_up(x, m):
    return ((int(x) + m - 1) // m) * m


def _leaky_relu(x, alpha=0.2):
    return jnp.where(x > 0, x, alpha * x)


def _forward_block(nf, ef, sd_oh, mask,
                   ai_w, ai_b, node_w, edge_w, gm_bias, adot_row, adot_b, wgt_b,
                   ao_wn, ao_wh, ao_b, ip_wh, ip_wn, ip_b, op_w, op_b,
                   *, gather_dtype, recip):
    """Fused per-graph math shared by the kernel body and the pure-JAX reference.

    nf    : (Vmax, node_in) f32     padded node features of one graph
    ef    : (Emax, edge_in) f32     padded edge features (zero rows for padding)
    sd_oh : (Emax, 2*Vmax)          [dst one-hot | src one-hot]; all-zero rows for padded edges
    mask  : (1, Vmax)               1 for real nodes (graph-sum readout row)
    """
    dot = functools.partial(jnp.dot, preferred_element_type=jnp.float32)
    # scatter: contract over the edge axis (transposed-LHS matmul on dst_oh).
    scatter = functools.partial(
        lax.dot_general, dimension_numbers=(((0,), (0,)), ((), ())),
        preferred_element_type=jnp.float32)
    lrelu = _leaky_relu
    gd = gather_dtype

    depth, H = node_w.shape[0], node_w.shape[1]
    Vmax = nf.shape[0]

    # dst one-hot is the lane-prefix half of sd_oh, so this slice needs no rotate.
    dst_oh = sd_oh[:, :Vmax]                                    # (E, V)

    # ---- PAGTNGNN ----
    atom_input = lrelu(dot(nf, ai_w) + ai_b)                    # (V, H), nheads = 1
    atom_h = atom_input

    for d in range(depth):                                      # unrolled PAGTN layers
        node_proj = dot(atom_h, node_w[d])                      # (V, 5H) f32
        edge_proj = dot(ef, edge_w[d])                          # (E, 2H) f32
        dst_cols = node_proj[:, : 2 * H].astype(gd)             # (V, 2H) prefix  [a_dst | m_dst]
        src_cols = node_proj[:, 2 * H: 4 * H].astype(gd)        # (V, 2H)         [a_src | m_src]
        wgt_proj = node_proj[:, 4 * H:]                         # (V, H)
        # TODO(synk): src_cols / wgt_proj start at lane offsets 2H / 4H; pad the fused
        # node_w segments to 128-lane multiples if the lowered bundle shows relayouts.

        # Fused src+dst gather: one (E,2V)@(2V,2H) matmul (double K fill, half the launches).
        ds_cols = jnp.concatenate([dst_cols, src_cols], axis=0)     # (2V, 2H)
        gathered = dot(sd_oh, ds_cols) + edge_proj                  # (E, 2H)
        am = lrelu(gathered + gm_bias[d])                           # biases folded (exact:
        e_atn, msg_in = am[:, :H], am[:, H:]                        # one-hot rows sum to 1)

        # attention logits: lane reduce instead of an N=1 MXU matmul.
        scores = jnp.sum(e_atn * adot_row[d], axis=-1, keepdims=True) + adot_b[d]   # (E, 1)

        # edge_softmax over incoming edges of each destination node. A per-graph-block
        # max is a constant shift per destination, so it is an exact stabiliser and
        # removes the (E,V) masked temporary + per-edge max gather of the old version.
        smax = jnp.max(scores, axis=0, keepdims=True)            # (1, 1)
        exp_s = jnp.exp(scores - smax)                           # (E, 1)

        # Fused message + denominator scatter: sum_e softmax(e)*msg(e) =
        # (sum_e exp*msg) / (sum_e exp); both sums from ONE (E,V)-contraction.
        payload = jnp.concatenate([exp_s * msg_in, exp_s], axis=1).astype(gd)   # (E, H+1)
        scat = scatter(dst_oh, payload)                          # (V, H+1) f32
        agg_un = scat[:, :H]
        denom = jnp.maximum(scat[:, H:], 1e-30)                  # zero in-degree / padded nodes
        agg = agg_un * recip(denom)                              # (V, H)

        attn_h = lrelu(agg + wgt_proj + wgt_b[d])
        atom_h = jnp.maximum(attn_h + atom_input, 0.0)           # residual + ReLU

    # atom_out over concat([node_feats, atom_h]) — concat folded into split weights.
    gnn_out = lrelu(dot(nf, ao_wn) + dot(atom_h, ao_wh) + ao_b)

    # ---- Predictor head: concat([gnn_out, node_feats]) -> MLPNodeReadout (mode='sum') ----
    h = dot(gnn_out, ip_wh) + dot(nf, ip_wn) + ip_b
    h = dot(h, op_w) + op_b                                      # (V, n_tasks)
    # per-graph sum readout: bf16 operands (mask is exact), f32 accumulation.
    return dot(mask, h.astype(gd))                               # (1, n_tasks)


def _pagtn_kernel(*refs):
    nf_ref, ef_ref, sd_ref, mask_ref = refs[:4]
    w_refs = refs[4:-1]
    out_ref = refs[-1]
    out_ref[...] = _forward_block(
        nf_ref[...], ef_ref[...], sd_ref[...], mask_ref[...],
        *[r[...] for r in w_refs],
        gather_dtype=jnp.bfloat16,
        recip=lambda x: pl.reciprocal(x, approx=True))


def fuse_params(p):
    """Fold concats / biases into fused kernel parameters (wrapper-side, never in-kernel)."""
    # [a_dst | m_dst | a_src | m_src | wgt]: dst first so the fused-gather RHS row order
    # matches the [dst | src] one-hot and the scatter operand is a lane-prefix slice.
    node_w = jnp.concatenate(
        [p["adr_w"], p["mdr_w"], p["asr_w"], p["msr_w"], p["wgt_w"]], axis=2)   # (D, H, 5H)
    edge_w = jnp.concatenate([p["aeg_w"], p["meg_w"]], axis=2)                  # (D, Ein, 2H)
    gm_bias = jnp.concatenate(
        [p["asr_b"] + p["adr_b"] + p["aeg_b"],
         p["msr_b"] + p["mdr_b"] + p["meg_b"]], axis=2)                         # (D, 1, 2H)
    adot_row = jnp.swapaxes(p["adot_w"], 1, 2)                                  # (D, 1, H)
    fused = {"node_w": node_w, "edge_w": edge_w, "gm_bias": gm_bias,
             "adot_row": adot_row, "adot_b": p["adot_b"], "wgt_b": p["wgt_b"]}
    for name in ("ai_w", "ai_b", "ao_wn", "ao_wh", "ao_b",
                 "ip_wh", "ip_wn", "ip_b", "op_w", "op_b"):
        fused[name] = p[name]
    return fused


# ---------------- VMEM / cost accounting ----------------

def _padded_bytes(shape, dtype):
    """Bytes of a VMEM-resident array after (sublane, lane) layout padding."""
    itemsize = int(np.dtype(dtype).itemsize)
    s = [int(d) for d in shape]
    if not s:
        return 4
    s[-1] = _round_up(s[-1], 128)
    if len(s) >= 2:
        s[-2] = _round_up(s[-2], 8 * max(1, 4 // itemsize))
    return int(np.prod(s)) * itemsize


def _vmem_capacity_bytes():
    try:
        return int(pltpu.get_tpu_info().vmem_capacity_bytes)
    except Exception:
        return 64 * 1024 * 1024        # conservative fallback (valid on all generations)


def _vmem_limit_bytes(Vmax, Emax, H, node_in, edge_in, node_out, n_tasks, weights):
    f32, bf16 = jnp.float32, jnp.bfloat16
    # resident weights (constant index maps -> single copy)
    w_bytes = sum(_padded_bytes(w.shape, w.dtype) for w in weights)
    # double-buffered per-graph blocks (inputs + output)
    blk = (_padded_bytes((Vmax, node_in), f32)
           + _padded_bytes((Emax, edge_in), f32)
           + _padded_bytes((Emax, 2 * Vmax), bf16)
           + _padded_bytes((1, Vmax), bf16)
           + _padded_bytes((1, n_tasks), f32))
    # dominant live temporaries inside one layer
    tmp = (_padded_bytes((Vmax, 5 * H), f32)                 # node_proj
           + 3 * _padded_bytes((Emax, 2 * H), f32)           # edge_proj / gathered / am
           + _padded_bytes((2 * Vmax, 2 * H), bf16)          # ds_cols
           + _padded_bytes((Emax, H + 1), bf16)              # payload
           + 3 * _padded_bytes((Emax, 1), f32)               # scores / exp_s
           + _padded_bytes((Vmax, H + 1), f32)               # scatter result
           + 4 * _padded_bytes((Vmax, H), f32)               # atom_input/atom_h/agg/attn_h
           + 2 * _padded_bytes((Vmax, node_out), f32))       # head temporaries
    need = w_bytes + 2 * blk + 2 * tmp                       # 2x slack on temporaries
    cap = _vmem_capacity_bytes()
    # ~109 MiB on v5e/v6e (128 MiB VMEM), ~54 MiB on v7x (64 MiB) when need is small.
    return int(min(max(need, 32 * 1024 * 1024), int(cap * 0.85)))


def _cost_estimate(G, Vmax, Emax, H, depth, node_in, edge_in, node_out, n_tasks,
                   in_bytes, out_bytes):
    per_layer = (2 * Vmax * H * 5 * H                  # fused node projection
                 + 2 * Emax * edge_in * 2 * H          # fused edge projection
                 + 2 * Emax * (2 * Vmax) * 2 * H       # fused src/dst gather
                 + 2 * Emax * Vmax * (H + 1))          # fused message+denominator scatter
    head = (2 * Vmax * node_in * H
            + 2 * Vmax * (node_in + H) * node_out
            + 2 * Vmax * (node_out + node_in) * node_out
            + 2 * Vmax * node_out * n_tasks
            + 2 * Vmax * n_tasks)
    return pl.CostEstimate(flops=int(G * (depth * per_layer + head)),
                           transcendentals=int(G * depth * Emax),
                           bytes_accessed=int(in_bytes + out_bytes))


# ---------------- Pallas entry point ----------------

@jax.jit
def pagtn_predictor_pallas(nf_b, ef_b, sd_b, mask_b, params):
    """Per-graph-gridded PAGTNPredictor forward (eval mode, nheads=1, mode='sum').

    nf_b   : (G, Vmax, node_in)  padded per-graph node features
    ef_b   : (G, Emax, edge_in)  padded per-graph edge features
    sd_b   : (G, Emax, 2*Vmax)   [dst | src] one-hot (local node ids, zero rows = padding)
    mask_b : (G, 1, Vmax)        1.0 for real nodes
    """
    fused = fuse_params(params)
    weights = [fused[name] for name in KERNEL_ARG_ORDER]

    G, Vmax, node_in = nf_b.shape
    Emax, edge_in = ef_b.shape[1], ef_b.shape[2]
    depth, H = fused["node_w"].shape[0], fused["node_w"].shape[1]
    node_out = fused["ao_wn"].shape[1]
    n_tasks = fused["op_w"].shape[1]

    # One-hot gather/scatter matrices are exact in bf16: halves their VMEM/DMA footprint
    # and runs the (E,V)-contraction matmuls on the bf16 MXU path (f32 accumulation).
    # TODO(synk): evaluate fp8(e4m3) one-hots on v7x once mixed fp8 x bf16 MXU operands land.
    sd_bf = sd_b.astype(jnp.bfloat16)
    mask_bf = mask_b.astype(jnp.bfloat16)
    graph_inputs = [nf_b, ef_b, sd_bf, mask_bf]

    graph_specs = [
        pl.BlockSpec((None, Vmax, node_in), lambda g: (g, 0, 0)),
        pl.BlockSpec((None, Emax, edge_in), lambda g: (g, 0, 0)),
        pl.BlockSpec((None, Emax, 2 * Vmax), lambda g: (g, 0, 0)),
        pl.BlockSpec((None, 1, Vmax), lambda g: (g, 0, 0)),
    ]
    # Full-array blocks with constant index maps: weights stay VMEM-resident across
    # grid steps (no per-graph re-DMA).
    weight_specs = [
        pl.BlockSpec(tuple(w.shape), lambda g, _z=(0,) * w.ndim: _z) for w in weights
    ]

    out_shape = jax.ShapeDtypeStruct((G, 1, n_tasks), jnp.float32)
    out_spec = pl.BlockSpec((None, 1, n_tasks), lambda g: (g, 0, 0))

    in_bytes = sum(int(np.prod(x.shape)) * int(np.dtype(x.dtype).itemsize)
                   for x in graph_inputs + weights)
    out_bytes = G * n_tasks * 4

    # TODO(synk): for graphs too large for a single (E_g, V_g) block, replace the dense
    # one-hot formulation with scalar-prefetch indexed edge streaming over an E-tile grid
    # plus a (V, H) VMEM accumulator (two-pass per-destination softmax combine).
    out = pl.pallas_call(
        _pagtn_kernel,
        grid=(G,),
        in_specs=graph_specs + weight_specs,
        out_specs=out_spec,
        out_shape=out_shape,
        compiler_params=pltpu.CompilerParams(
            # graphs are independent blocks -> shard the grid across both v7x TensorCores
            dimension_semantics=("parallel",),
            vmem_limit_bytes=_vmem_limit_bytes(Vmax, Emax, H, node_in, edge_in,
                                               node_out, n_tasks, weights)),
        cost_estimate=_cost_estimate(G, Vmax, Emax, H, depth, node_in, edge_in,
                                     node_out, n_tasks, in_bytes, out_bytes),
    )(*graph_inputs, *weights)
    return out.reshape(G, n_tasks)


# ---------------- Host-side graph packing ----------------

def pack_graph_batch(node_feats, edge_feats, src, dst, node_graph_id, n_graphs,
                     *, round_to=16):
    """Pad a flat batched graph into uniform per-graph blocks for the gridded kernel.

    Returns (nf_b, ef_b, sd_b, mask_b): see pagtn_predictor_pallas. Padded edge rows have
    all-zero one-hots (finite scores, zero denominator contribution); padded node rows are
    masked out of the readout and never referenced by real edges.
    """
    node_feats = np.asarray(node_feats, np.float32)
    edge_feats = np.asarray(edge_feats, np.float32)
    src = np.asarray(src, np.int64)
    dst = np.asarray(dst, np.int64)
    node_graph_id = np.asarray(node_graph_id, np.int64)
    _, Fn = node_feats.shape
    _, Fe = edge_feats.shape

    nodes_per_g = [np.where(node_graph_id == g)[0] for g in range(n_graphs)]
    edge_gid = node_graph_id[dst]            # edges never cross graphs in a DGL batch
    edges_per_g = [np.where(edge_gid == g)[0] for g in range(n_graphs)]

    Vmax = _round_up(max(1, max(len(n) for n in nodes_per_g)), round_to)
    Emax = _round_up(max(1, max(len(e) for e in edges_per_g)), round_to)

    nf_b = np.zeros((n_graphs, Vmax, Fn), np.float32)
    ef_b = np.zeros((n_graphs, Emax, Fe), np.float32)
    sd_b = np.zeros((n_graphs, Emax, 2 * Vmax), np.float32)
    mask_b = np.zeros((n_graphs, 1, Vmax), np.float32)
    for g in range(n_graphs):
        nid, eid = nodes_per_g[g], edges_per_g[g]
        local = {int(n): i for i, n in enumerate(nid)}
        nf_b[g, :len(nid)] = node_feats[nid]
        mask_b[g, 0, :len(nid)] = 1.0
        ef_b[g, :len(eid)] = edge_feats[eid]
        for i, e in enumerate(eid):
            sd_b[g, i, local[int(dst[e])]] = 1.0              # dst half first (prefix)
            sd_b[g, i, Vmax + local[int(src[e])]] = 1.0       # src half
    return (jnp.asarray(nf_b), jnp.asarray(ef_b),
            jnp.asarray(sd_b), jnp.asarray(mask_b))


# ---------------- References ----------------

def pagtn_predictor_ref(nf_b, ef_b, sd_b, mask_b, params, gather_dtype=jnp.float32):
    """Pure-JAX reference using the same fused per-graph math as the kernel (no Pallas)."""
    fused = fuse_params(params)
    w = [fused[name] for name in KERNEL_ARG_ORDER]

    def one_graph(nf, ef, sd, m):
        return _forward_block(nf, ef, sd.astype(gather_dtype), m.astype(gather_dtype), *w,
                              gather_dtype=gather_dtype, recip=lambda x: 1.0 / x)

    out = jax.vmap(one_graph)(nf_b, ef_b, sd_b, mask_b)   # (G, 1, n_tasks)
    return out.reshape(nf_b.shape[0], -1)


def pagtn_predictor_original(node_feats, edge_feats, src_oh, dst_oh, graph_oh, p):
    """Straight f32 transcription of PAGTNPredictor.forward (unfused) — semantic ground truth."""
    dot = functools.partial(jnp.dot, preferred_element_type=jnp.float32)
    lrelu = _leaky_relu
    depth = p["asr_w"].shape[0]

    atom_input = lrelu(dot(node_feats, p["ai_w"]) + p["ai_b"])
    atom_h = atom_input
    for d in range(depth):
        a_src = dot(atom_h, p["asr_w"][d]) + p["asr_b"][d]
        a_dst = dot(atom_h, p["adr_w"][d]) + p["adr_b"][d]
        a_edg = dot(edge_feats, p["aeg_w"][d]) + p["aeg_b"][d]
        e_atn = lrelu(dot(src_oh, a_src) + dot(dst_oh, a_dst) + a_edg)
        scores = dot(e_atn, p["adot_w"][d]) + p["adot_b"][d]

        masked = jnp.where(dst_oh != 0, scores, NEG_INF)
        max_e = dot(dst_oh, jnp.max(masked, axis=0, keepdims=True).T)
        exp_s = jnp.exp(scores - max_e)
        attn = exp_s / dot(dst_oh, dot(dst_oh.T, exp_s))

        m_src = dot(atom_h, p["msr_w"][d]) + p["msr_b"][d]
        m_dst = dot(atom_h, p["mdr_w"][d]) + p["mdr_b"][d]
        m_edg = dot(edge_feats, p["meg_w"][d]) + p["meg_b"][d]
        msg_in = lrelu(dot(src_oh, m_src) + dot(dst_oh, m_dst) + m_edg)
        agg = dot(dst_oh.T, attn * msg_in)

        attn_h = lrelu(agg + dot(atom_h, p["wgt_w"][d]) + p["wgt_b"][d])
        atom_h = jnp.maximum(attn_h + atom_input, 0.0)

    gnn_out = lrelu(dot(node_feats, p["ao_wn"]) + dot(atom_h, p["ao_wh"]) + p["ao_b"])
    h = dot(gnn_out, p["ip_wh"]) + dot(node_feats, p["ip_wn"]) + p["ip_b"]
    h = dot(h, p["op_w"]) + p["op_b"]
    return dot(graph_oh, h)


def init_params(key, node_in, node_out, node_hid, edge_in, depth, n_tasks):
    """Deterministic synthetic parameters.  Weights stored (in, out) so math does x @ w."""
    state = [key]

    def nk():
        state[0], sub = jax.random.split(state[0])
        return sub

    def lin(in_f, out_f):
        w = jax.random.normal(nk(), (in_f, out_f), jnp.float32) * (1.0 / np.sqrt(in_f))
        b = jax.random.normal(nk(), (1, out_f), jnp.float32) * 0.01
        return w, b

    def stacked(in_f, out_f):
        ws, bs = zip(*[lin(in_f, out_f) for _ in range(depth)])
        return jnp.stack(ws), jnp.stack(bs)            # (D, in, out), (D, 1, out)

    H = node_hid
    p = {}
    p["ai_w"], p["ai_b"] = lin(node_in, H)             # atom_inp (nheads=1)
    p["asr_w"], p["asr_b"] = stacked(H, H)             # attn_src
    p["adr_w"], p["adr_b"] = stacked(H, H)             # attn_dst
    p["aeg_w"], p["aeg_b"] = stacked(edge_in, H)       # attn_edg
    p["adot_w"], p["adot_b"] = stacked(H, 1)           # attn_dot
    p["msr_w"], p["msr_b"] = stacked(H, H)             # msg_src
    p["mdr_w"], p["mdr_b"] = stacked(H, H)             # msg_dst
    p["meg_w"], p["meg_b"] = stacked(edge_in, H)       # msg_edg
    p["wgt_w"], p["wgt_b"] = stacked(H, H)             # wgt_n
    # atom_out: Linear(node_in + H, node_out) split over concat([node_feats, atom_h])
    p["ao_wn"], p["ao_b"] = lin(node_in, node_out)
    p["ao_wh"], _ = lin(H, node_out)
    # readout in_project: Linear(node_out + node_in, node_out) over concat([gnn_out, node_feats])
    p["ip_wh"], p["ip_b"] = lin(node_out, node_out)
    p["ip_wn"], _ = lin(node_in, node_out)
    p["op_w"], p["op_b"] = lin(node_out, n_tasks)      # readout out_project
    return p


if __name__ == "__main__":
    # Small config consistent with the module.
    node_in_feats, node_out_feats, node_hid_feats = 16, 32, 32
    edge_in_feats, depth, n_tasks = 8, 3, 1
    n_graphs, nodes_per_graph = 2, 8
    V = n_graphs * nodes_per_graph

    # Batch of 2 complete directed graphs (no self loops), PAGTN-style.
    src_list, dst_list = [], []
    for g in range(n_graphs):
        base = g * nodes_per_graph
        for u in range(nodes_per_graph):
            for v in range(nodes_per_graph):
                if u != v:
                    src_list.append(base + u)
                    dst_list.append(base + v)
    E = len(src_list)

    key = jax.random.PRNGKey(0)
    k_nf, k_ef, k_p = jax.random.split(key, 3)
    node_feats = jax.random.normal(k_nf, (V, node_in_feats), jnp.float32)
    edge_feats = jax.random.normal(k_ef, (E, edge_in_feats), jnp.float32)
    params = init_params(k_p, node_in_feats, node_out_feats, node_hid_feats,
                         edge_in_feats, depth, n_tasks)

    node_graph_id = np.arange(V) // nodes_per_graph
    nf_b, ef_b, sd_b, mask_b = pack_graph_batch(
        node_feats, edge_feats, np.array(src_list), np.array(dst_list),
        node_graph_id, n_graphs)

    out = jax.block_until_ready(
        pagtn_predictor_pallas(nf_b, ef_b, sd_b, mask_b, params))

    assert out.shape == (n_graphs, n_tasks), out.shape
    assert bool(jnp.all(jnp.isfinite(out))), "non-finite output"

    # 1) Tight check: kernel vs. precision-matched pure-JAX reference (same fused per-graph
    #    math, bf16 one-hot matmuls). atol allows for the in-kernel approximate reciprocal.
    ref_matched = jax.block_until_ready(
        pagtn_predictor_ref(nf_b, ef_b, sd_b, mask_b, params, gather_dtype=jnp.bfloat16))
    np.testing.assert_allclose(np.asarray(out), np.asarray(ref_matched),
                               rtol=2e-2, atol=5e-2)

    # 2) Drift sanity check: kernel vs. the straight f32 transcription of the PyTorch
    #    module on the flat (unpadded) batch — bounds bf16 / approx-reciprocal /
    #    per-graph-max-stabiliser drift and catches any padding or wiring errors.
    src_oh = jax.nn.one_hot(jnp.array(src_list, jnp.int32), V, dtype=jnp.float32)   # (E, V)
    dst_oh = jax.nn.one_hot(jnp.array(dst_list, jnp.int32), V, dtype=jnp.float32)   # (E, V)
    graph_oh = jax.nn.one_hot(jnp.arange(V) // nodes_per_graph, n_graphs,
                              dtype=jnp.float32).T                                   # (G, V)
    ref_f32 = jax.block_until_ready(
        pagtn_predictor_original(node_feats, edge_feats, src_oh, dst_oh, graph_oh, params))
    np.testing.assert_allclose(np.asarray(out), np.asarray(ref_f32), rtol=1e-1, atol=1.0)

    print("KERNEL_OK")
</pallas_src>

<mosaic_0001>
module attributes {stable_mosaic.version = 11 : i64} {
  func.func @_pagtn_kernel(%arg0: i32, %arg1: memref<1x16x16xf32, #tpu.memory_space<vmem>>, %arg2: memref<1x64x8xf32, #tpu.memory_space<vmem>>, %arg3: memref<1x64x32xbf16, #tpu.memory_space<vmem>>, %arg4: memref<1x1x16xbf16, #tpu.memory_space<vmem>>, %arg5: memref<16x32xf32, #tpu.memory_space<vmem>>, %arg6: memref<1x32xf32, #tpu.memory_space<vmem>>, %arg7: memref<3x32x160xf32, #tpu.memory_space<vmem>>, %arg8: memref<3x8x64xf32, #tpu.memory_space<vmem>>, %arg9: memref<3x1x64xf32, #tpu.memory_space<vmem>>, %arg10: memref<3x1x32xf32, #tpu.memory_space<vmem>>, %arg11: memref<3x1x1xf32, #tpu.memory_space<vmem>>, %arg12: memref<3x1x32xf32, #tpu.memory_space<vmem>>, %arg13: memref<16x32xf32, #tpu.memory_space<vmem>>, %arg14: memref<32x32xf32, #tpu.memory_space<vmem>>, %arg15: memref<1x32xf32, #tpu.memory_space<vmem>>, %arg16: memref<32x32xf32, #tpu.memory_space<vmem>>, %arg17: memref<16x32xf32, #tpu.memory_space<vmem>>, %arg18: memref<1x32xf32, #tpu.memory_space<vmem>>, %arg19: memref<32x1xf32, #tpu.memory_space<vmem>>, %arg20: memref<1x1xf32, #tpu.memory_space<vmem>>, %arg21: memref<1x1x1xf32, #tpu.memory_space<vmem>>) attributes {dimension_semantics = [#tpu.dimension_semantics<parallel>], iteration_bounds = array<i64: 2>, scalar_prefetch = 0 : i64, scratch_operands = 0 : i64, tpu.core_type = #tpu.core_type<tc>, window_params = [{transform_indices = @transform_0, window_bounds = array<i64: 1, 16, 16>}, {transform_indices = @transform_1, window_bounds = array<i64: 1, 64, 8>}, {transform_indices = @transform_2, window_bounds = array<i64: 1, 64, 32>}, {transform_indices = @transform_3, window_bounds = array<i64: 1, 1, 16>}, {pipeline_mode = #tpu.pipeline_mode<synchronous>, transform_indices = @transform_4, window_bounds = array<i64: 16, 32>}, {pipeline_mode = #tpu.pipeline_mode<synchronous>, transform_indices = @transform_5, window_bounds = array<i64: 1, 32>}, {pipeline_mode = #tpu.pipeline_mode<synchronous>, transform_indices = @transform_6, window_bounds = array<i64: 3, 32, 160>}, {pipeline_mode = #tpu.pipeline_mode<synchronous>, transform_indices = @transform_7, window_bounds = array<i64: 3, 8, 64>}, {pipeline_mode = #tpu.pipeline_mode<synchronous>, transform_indices = @transform_8, window_bounds = array<i64: 3, 1, 64>}, {pipeline_mode = #tpu.pipeline_mode<synchronous>, transform_indices = @transform_9, window_bounds = array<i64: 3, 1, 32>}, {pipeline_mode = #tpu.pipeline_mode<synchronous>, transform_indices = @transform_10, window_bounds = array<i64: 3, 1, 1>}, {pipeline_mode = #tpu.pipeline_mode<synchronous>, transform_indices = @transform_11, window_bounds = array<i64: 3, 1, 32>}, {pipeline_mode = #tpu.pipeline_mode<synchronous>, transform_indices = @transform_12, window_bounds = array<i64: 16, 32>}, {pipeline_mode = #tpu.pipeline_mode<synchronous>, transform_indices = @transform_13, window_bounds = array<i64: 32, 32>}, {pipeline_mode = #tpu.pipeline_mode<synchronous>, transform_indices = @transform_14, window_bounds = array<i64: 1, 32>}, {pipeline_mode = #tpu.pipeline_mode<synchronous>, transform_indices = @transform_15, window_bounds = array<i64: 32, 32>}, {pipeline_mode = #tpu.pipeline_mode<synchronous>, transform_indices = @transform_16, window_bounds = array<i64: 16, 32>}, {pipeline_mode = #tpu.pipeline_mode<synchronous>, transform_indices = @transform_17, window_bounds = array<i64: 1, 32>}, {pipeline_mode = #tpu.pipeline_mode<synchronous>, transform_indices = @transform_18, window_bounds = array<i64: 32, 1>}, {pipeline_mode = #tpu.pipeline_mode<synchronous>, transform_indices = @transform_19, window_bounds = array<i64: 1, 1>}, {transform_indices = @transform_20, window_bounds = array<i64: 1, 1, 1>}]} {
    %c0 = arith.constant 0 : index
    %c0_0 = arith.constant 0 : index
    %c0_1 = arith.constant 0 : index
    %0 = vector.load %arg1[%c0, %c0_0, %c0_1] : memref<1x16x16xf32, #tpu.memory_space<vmem>>, vector<1x16x16xf32>
    %1 = vector.shape_cast %0 : vector<1x16x16xf32> to vector<16x16xf32>
    %c0_2 = arith.constant 0 : index
    %c0_3 = arith.constant 0 : index
    %c0_4 = arith.constant 0 : index
    %2 = vector.load %arg2[%c0_2, %c0_3, %c0_4] : memref<1x64x8xf32, #tpu.memory_space<vmem>>, vector<1x64x8xf32>
    %3 = vector.shape_cast %2 : vector<1x64x8xf32> to vector<64x8xf32>
    %c0_5 = arith.constant 0 : index
    %c0_6 = arith.constant 0 : index
    %c0_7 = arith.constant 0 : index
    %4 = vector.load %arg3[%c0_5, %c0_6, %c0_7] : memref<1x64x32xbf16, #tpu.memory_space<vmem>>, vector<1x64x32xbf16>
    %5 = vector.shape_cast %4 : vector<1x64x32xbf16> to vector<64x32xbf16>
    %c0_8 = arith.constant 0 : index
    %c0_9 = arith.constant 0 : index
    %c0_10 = arith.constant 0 : index
    %6 = vector.load %arg4[%c0_8, %c0_9, %c0_10] : memref<1x1x16xbf16, #tpu.memory_space<vmem>>, vector<1x1x16xbf16>
    %7 = vector.shape_cast %6 : vector<1x1x16xbf16> to vector<1x16xbf16>
    %c0_11 = arith.constant 0 : index
    %c0_12 = arith.constant 0 : index
    %8 = vector.load %arg5[%c0_11, %c0_12] : memref<16x32xf32, #tpu.memory_space<vmem>>, vector<16x32xf32>
    %c0_13 = arith.constant 0 : index
    %c0_14 = arith.constant 0 : index
    %9 = vector.load %arg6[%c0_13, %c0_14] : memref<1x32xf32, #tpu.memory_space<vmem>>, vector<1x32xf32>
    %c0_15 = arith.constant 0 : index
    %c0_16 = arith.constant 0 : index
    %c0_17 = arith.constant 0 : index
    %10 = vector.load %arg7[%c0_15, %c0_16, %c0_17] : memref<3x32x160xf32, #tpu.memory_space<vmem>>, vector<3x32x160xf32>
    %c0_18 = arith.constant 0 : index
    %c0_19 = arith.constant 0 : index
    %c0_20 = arith.constant 0 : index
    %11 = vector.load %arg8[%c0_18, %c0_19, %c0_20] : memref<3x8x64xf32, #tpu.memory_space<vmem>>, vector<3x8x64xf32>
    %c0_21 = arith.constant 0 : index
    %c0_22 = arith.constant 0 : index
    %c0_23 = arith.constant 0 : index
    %12 = vector.load %arg9[%c0_21, %c0_22, %c0_23] : memref<3x1x64xf32, #tpu.memory_space<vmem>>, vector<3x1x64xf32>
    %c0_24 = arith.constant 0 : index
    %c0_25 = arith.constant 0 : index
    %c0_26 = arith.constant 0 : index
    %13 = vector.load %arg10[%c0_24, %c0_25, %c0_26] : memref<3x1x32xf32, #tpu.memory_space<vmem>>, vector<3x1x32xf32>
    %c0_27 = arith.constant 0 : index
    %c0_28 = arith.constant 0 : index
    %c0_29 = arith.constant 0 : index
    %14 = vector.load %arg11[%c0_27, %c0_28, %c0_29] : memref<3x1x1xf32, #tpu.memory_space<vmem>>, vector<3x1x1xf32>
    %c0_30 = arith.constant 0 : index
    %c0_31 = arith.constant 0 : index
    %c0_32 = arith.constant 0 : index
    %15 = vector.load %arg12[%c0_30, %c0_31, %c0_32] : memref<3x1x32xf32, #tpu.memory_space<vmem>>, vector<3x1x32xf32>
    %c0_33 = arith.constant 0 : index
    %c0_34 = arith.constant 0 : index
    %16 = vector.load %arg13[%c0_33, %c0_34] : memref<16x32xf32, #tpu.memory_space<vmem>>, vector<16x32xf32>
    %c0_35 = arith.constant 0 : index
    %c0_36 = arith.constant 0 : index
    %17 = vector.load %arg14[%c0_35, %c0_36] : memref<32x32xf32, #tpu.memory_space<vmem>>, vector<32x32xf32>
    %c0_37 = arith.constant 0 : index
    %c0_38 = arith.constant 0 : index
    %18 = vector.load %arg15[%c0_37, %c0_38] : memref<1x32xf32, #tpu.memory_space<vmem>>, vector<1x32xf32>
    %c0_39 = arith.constant 0 : index
    %c0_40 = arith.constant 0 : index
    %19 = vector.load %arg16[%c0_39, %c0_40] : memref<32x32xf32, #tpu.memory_space<vmem>>, vector<32x32xf32>
    %c0_41 = arith.constant 0 : index
    %c0_42 = arith.constant 0 : index
    %20 = vector.load %arg17[%c0_41, %c0_42] : memref<16x32xf32, #tpu.memory_space<vmem>>, vector<16x32xf32>
    %c0_43 = arith.constant 0 : index
    %c0_44 = arith.constant 0 : index
    %21 = vector.load %arg18[%c0_43, %c0_44] : memref<1x32xf32, #tpu.memory_space<vmem>>, vector<1x32xf32>
    %c0_45 = arith.constant 0 : index
    %c0_46 = arith.constant 0 : index
    %22 = vector.load %arg19[%c0_45, %c0_46] : memref<32x1xf32, #tpu.memory_space<vmem>>, vector<32x1xf32>
    %c0_47 = arith.constant 0 : index
    %c0_48 = arith.constant 0 : index
    %23 = vector.load %arg20[%c0_47, %c0_48] : memref<1x1xf32, #tpu.memory_space<vmem>>, vector<1x1xf32>
    %24 = vector.extract_strided_slice %5 {offsets = [0, 0], sizes = [64, 16], strides = [1, 1]} : vector<64x32xbf16> to vector<64x16xbf16>
    %cst = arith.constant dense<0.000000e+00> : vector<16x32xf32>
    %25 = tpu.matmul %1, %8, %cst {dimension_numbers = #tpu.dot_dimension_numbers<[1], [0], [0], [1], [0, 0, 1, 1], [], []>} : vector<16x16xf32>, vector<16x32xf32>, vector<16x32xf32> -> vector<16x32xf32>
    %26 = vector.broadcast %9 : vector<1x32xf32> to vector<16x32xf32>
    %27 = arith.addf %25, %26 : vector<16x32xf32>
    %cst_49 = arith.constant 0.000000e+00 : f32
    %28 = vector.broadcast %cst_49 : f32 to vector<16x32xf32>
    %29 = arith.cmpf ogt, %27, %28 : vector<16x32xf32>
    %cst_50 = arith.constant 2.000000e-01 : f32
    %30 = vector.broadcast %cst_50 : f32 to vector<16x32xf32>
    %31 = arith.mulf %30, %27 : vector<16x32xf32>
    %32 = arith.select %29, %27, %31 : vector<16x32xi1>, vector<16x32xf32>
    %33 = vector.extract_strided_slice %10 {offsets = [0, 0, 0], sizes = [1, 32, 160], strides = [1, 1, 1]} : vector<3x32x160xf32> to vector<1x32x160xf32>
    %34 = vector.shape_cast %33 : vector<1x32x160xf32> to vector<32x160xf32>
    %cst_51 = arith.constant dense<0.000000e+00> : vector<16x160xf32>
    %35 = tpu.matmul %32, %34, %cst_51 {dimension_numbers = #tpu.dot_dimension_numbers<[1], [0], [0], [1], [0, 0, 1, 1], [], []>} : vector<16x32xf32>, vector<32x160xf32>, vector<16x160xf32> -> vector<16x160xf32>
    %36 = vector.extract_strided_slice %11 {offsets = [0, 0, 0], sizes = [1, 8, 64], strides = [1, 1, 1]} : vector<3x8x64xf32> to vector<1x8x64xf32>
    %37 = vector.shape_cast %36 : vector<1x8x64xf32> to vector<8x64xf32>
    %cst_52 = arith.constant dense<0.000000e+00> : vector<64x64xf32>
    %38 = tpu.matmul %3, %37, %cst_52 {dimension_numbers = #tpu.dot_dimension_numbers<[1], [0], [0], [1], [0, 0, 1, 1], [], []>} : vector<64x8xf32>, vector<8x64xf32>, vector<64x64xf32> -> vector<64x64xf32>
    %39 = vector.extract_strided_slice %35 {offsets = [0, 0], sizes = [16, 64], strides = [1, 1]} : vector<16x160xf32> to vector<16x64xf32>
    %40 = arith.truncf %39 : vector<16x64xf32> to vector<16x64xbf16>
    %41 = vector.extract_strided_slice %35 {offsets = [0, 64], sizes = [16, 64], strides = [1, 1]} : vector<16x160xf32> to vector<16x64xf32>
    %42 = arith.truncf %41 : vector<16x64xf32> to vector<16x64xbf16>
    %43 = vector.extract_strided_slice %35 {offsets = [0, 128], sizes = [16, 32], strides = [1, 1]} : vector<16x160xf32> to vector<16x32xf32>
    %44 = tpu.concatenate %40, %42 in 0 : vector<16x64xbf16>, vector<16x64xbf16> -> vector<32x64xbf16>
    %cst_53 = arith.constant dense<0.000000e+00> : vector<64x64xf32>
    %45 = tpu.matmul %5, %44, %cst_53 {dimension_numbers = #tpu.dot_dimension_numbers<[1], [0], [0], [1], [0, 0, 1, 1], [], []>} : vector<64x32xbf16>, vector<32x64xbf16>, vector<64x64xf32> -> vector<64x64xf32>
    %46 = arith.addf %45, %38 : vector<64x64xf32>
    %47 = vector.extract_strided_slice %12 {offsets = [0, 0, 0], sizes = [1, 1, 64], strides = [1, 1, 1]} : vector<3x1x64xf32> to vector<1x1x64xf32>
    %48 = vector.shape_cast %47 : vector<1x1x64xf32> to vector<1x64xf32>
    %49 = vector.broadcast %48 : vector<1x64xf32> to vector<64x64xf32>
    %50 = arith.addf %46, %49 : vector<64x64xf32>
    %cst_54 = arith.constant 0.000000e+00 : f32
    %51 = vector.broadcast %cst_54 : f32 to vector<64x64xf32>
    %52 = arith.cmpf ogt, %50, %51 : vector<64x64xf32>
    %cst_55 = arith.constant 2.000000e-01 : f32
    %53 = vector.broadcast %cst_55 : f32 to vector<64x64xf32>
    %54 = arith.mulf %53, %50 : vector<64x64xf32>
    %55 = arith.select %52, %50, %54 : vector<64x64xi1>, vector<64x64xf32>
    %56 = vector.extract_strided_slice %55 {offsets = [0, 0], sizes = [64, 32], strides = [1, 1]} : vector<64x64xf32> to vector<64x32xf32>
    %57 = vector.extract_strided_slice %55 {offsets = [0, 32], sizes = [64, 32], strides = [1, 1]} : vector<64x64xf32> to vector<64x32xf32>
    %58 = vector.extract_strided_slice %13 {offsets = [0, 0, 0], sizes = [1, 1, 32], strides = [1, 1, 1]} : vector<3x1x32xf32> to vector<1x1x32xf32>
    %59 = vector.shape_cast %58 : vector<1x1x32xf32> to vector<1x32xf32>
    %60 = vector.broadcast %59 : vector<1x32xf32> to vector<64x32xf32>
    %61 = arith.mulf %56, %60 : vector<64x32xf32>
    %cst_56 = arith.constant dense<0.000000e+00> : vector<64xf32>
    %62 = vector.multi_reduction <add>, %61, %cst_56 [1] : vector<64x32xf32> to vector<64xf32>
    %63 = vector.shape_cast %62 : vector<64xf32> to vector<64x1xf32>
    %64 = vector.extract_strided_slice %14 {offsets = [0, 0, 0], sizes = [1, 1, 1], strides = [1, 1, 1]} : vector<3x1x1xf32> to vector<1x1x1xf32>
    %65 = vector.shape_cast %64 : vector<1x1x1xf32> to vector<1x1xf32>
    %66 = vector.broadcast %65 : vector<1x1xf32> to vector<64x1xf32>
    %67 = arith.addf %63, %66 : vector<64x1xf32>
    %cst_57 = arith.constant dense<0xFF800000> : vector<1xf32>
    %68 = vector.multi_reduction <maximumf>, %67, %cst_57 [0] : vector<64x1xf32> to vector<1xf32>
    %69 = vector.shape_cast %68 : vector<1xf32> to vector<1x1xf32>
    %70 = vector.broadcast %69 : vector<1x1xf32> to vector<64x1xf32>
    %71 = arith.subf %67, %70 : vector<64x1xf32>
    %72 = math.exp %71 : vector<64x1xf32>
    %73 = vector.broadcast %72 : vector<64x1xf32> to vector<64x32xf32>
    %74 = arith.mulf %73, %57 : vector<64x32xf32>
    %75 = tpu.concatenate %74, %72 in 1 : vector<64x32xf32>, vector<64x1xf32> -> vector<64x33xf32>
    %76 = arith.truncf %75 : vector<64x33xf32> to vector<64x33xbf16>
    %cst_58 = arith.constant dense<0.000000e+00> : vector<16x33xf32>
    %77 = tpu.matmul %24, %76, %cst_58 {dimension_numbers = #tpu.dot_dimension_numbers<[0], [0], [1], [1], [0, 1, 1, 1], [], []>} : vector<64x16xbf16>, vector<64x33xbf16>, vector<16x33xf32> -> vector<16x33xf32>
    %78 = vector.extract_strided_slice %77 {offsets = [0, 0], sizes = [16, 32], strides = [1, 1]} : vector<16x33xf32> to vector<16x32xf32>
    %79 = vector.extract_strided_slice %77 {offsets = [0, 32], sizes = [16, 1], strides = [1, 1]} : vector<16x33xf32> to vector<16x1xf32>
    %cst_59 = arith.constant 1.000000e-30 : f32
    %80 = vector.broadcast %cst_59 : f32 to vector<16x1xf32>
    %81 = arith.maximumf %79, %80 : vector<16x1xf32>
    %82 = tpu.reciprocal %81 {approx = true} : vector<16x1xf32> -> vector<16x1xf32>
    %83 = vector.broadcast %82 : vector<16x1xf32> to vector<16x32xf32>
    %84 = arith.mulf %78, %83 : vector<16x32xf32>
    %85 = arith.addf %84, %43 : vector<16x32xf32>
    %86 = vector.extract_strided_slice %15 {offsets = [0, 0, 0], sizes = [1, 1, 32], strides = [1, 1, 1]} : vector<3x1x32xf32> to vector<1x1x32xf32>
    %87 = vector.shape_cast %86 : vector<1x1x32xf32> to vector<1x32xf32>
    %88 = vector.broadcast %87 : vector<1x32xf32> to vector<16x32xf32>
    %89 = arith.addf %85, %88 : vector<16x32xf32>
    %cst_60 = arith.constant 0.000000e+00 : f32
    %90 = vector.broadcast %cst_60 : f32 to vector<16x32xf32>
    %91 = arith.cmpf ogt, %89, %90 : vector<16x32xf32>
    %cst_61 = arith.constant 2.000000e-01 : f32
    %92 = vector.broadcast %cst_61 : f32 to vector<16x32xf32>
    %93 = arith.mulf %92, %89 : vector<16x32xf32>
    %94 = arith.select %91, %89, %93 : vector<16x32xi1>, vector<16x32xf32>
    %95 = arith.addf %94, %32 : vector<16x32xf32>
    %cst_62 = arith.constant 0.000000e+00 : f32
    %96 = vector.broadcast %cst_62 : f32 to vector<16x32xf32>
    %97 = arith.maximumf %95, %96 : vector<16x32xf32>
    %98 = vector.extract_strided_slice %10 {offsets = [1, 0, 0], sizes = [1, 32, 160], strides = [1, 1, 1]} : vector<3x32x160xf32> to vector<1x32x160xf32>
    %99 = vector.shape_cast %98 : vector<1x32x160xf32> to vector<32x160xf32>
    %cst_63 = arith.constant dense<0.000000e+00> : vector<16x160xf32>
    %100 = tpu.matmul %97, %99, %cst_63 {dimension_numbers = #tpu.dot_dimension_numbers<[1], [0], [0], [1], [0, 0, 1, 1], [], []>} : vector<16x32xf32>, vector<32x160xf32>, vector<16x160xf32> -> vector<16x160xf32>
    %101 = vector.extract_strided_slice %11 {offsets = [1, 0, 0], sizes = [1, 8, 64], strides = [1, 1, 1]} : vector<3x8x64xf32> to vector<1x8x64xf32>
    %102 = vector.shape_cast %101 : vector<1x8x64xf32> to vector<8x64xf32>
    %cst_64 = arith.constant dense<0.000000e+00> : vector<64x64xf32>
    %103 = tpu.matmul %3, %102, %cst_64 {dimension_numbers = #tpu.dot_dimension_numbers<[1], [0], [0], [1], [0, 0, 1, 1], [], []>} : vector<64x8xf32>, vector<8x64xf32>, vector<64x64xf32> -> vector<64x64xf32>
    %104 = vector.extract_strided_slice %100 {offsets = [0, 0], sizes = [16, 64], strides = [1, 1]} : vector<16x160xf32> to vector<16x64xf32>
    %105 = arith.truncf %104 : vector<16x64xf32> to vector<16x64xbf16>
    %106 = vector.extract_strided_slice %100 {offsets = [0, 64], sizes = [16, 64], strides = [1, 1]} : vector<16x160xf32> to vector<16x64xf32>
    %107 = arith.truncf %106 : vector<16x64xf32> to vector<16x64xbf16>
    %108 = vector.extract_strided_slice %100 {offsets = [0, 128], sizes = [16, 32], strides = [1, 1]} : vector<16x160xf32> to vector<16x32xf32>
    %109 = tpu.concatenate %105, %107 in 0 : vector<16x64xbf16>, vector<16x64xbf16> -> vector<32x64xbf16>
    %cst_65 = arith.constant dense<0.000000e+00> : vector<64x64xf32>
    %110 = tpu.matmul %5, %109, %cst_65 {dimension_numbers = #tpu.dot_dimension_numbers<[1], [0], [0], [1], [0, 0, 1, 1], [], []>} : vector<64x32xbf16>, vector<32x64xbf16>, vector<64x64xf32> -> vector<64x64xf32>
    %111 = arith.addf %110, %103 : vector<64x64xf32>
    %112 = vector.extract_strided_slice %12 {offsets = [1, 0, 0], sizes = [1, 1, 64], strides = [1, 1, 1]} : vector<3x1x64xf32> to vector<1x1x64xf32>
    %113 = vector.shape_cast %112 : vector<1x1x64xf32> to vector<1x64xf32>
    %114 = vector.broadcast %113 : vector<1x64xf32> to vector<64x64xf32>
    %115 = arith.addf %111, %114 : vector<64x64xf32>
    %cst_66 = arith.constant 0.000000e+00 : f32
    %116 = vector.broadcast %cst_66 : f32 to vector<64x64xf32>
    %117 = arith.cmpf ogt, %115, %116 : vector<64x64xf32>
    %cst_67 = arith.constant 2.000000e-01 : f32
    %118 = vector.broadcast %cst_67 : f32 to vector<64x64xf32>
    %119 = arith.mulf %118, %115 : vector<64x64xf32>
    %120 = arith.select %117, %115, %119 : vector<64x64xi1>, vector<64x64xf32>
    %121 = vector.extract_strided_slice %120 {offsets = [0, 0], sizes = [64, 32], strides = [1, 1]} : vector<64x64xf32> to vector<64x32xf32>
    %122 = vector.extract_strided_slice %120 {offsets = [0, 32], sizes = [64, 32], strides = [1, 1]} : vector<64x64xf32> to vector<64x32xf32>
    %123 = vector.extract_strided_slice %13 {offsets = [1, 0, 0], sizes = [1, 1, 32], strides = [1, 1, 1]} : vector<3x1x32xf32> to vector<1x1x32xf32>
    %124 = vector.shape_cast %123 : vector<1x1x32xf32> to vector<1x32xf32>
    %125 = vector.broadcast %124 : vector<1x32xf32> to vector<64x32xf32>
    %126 = arith.mulf %121, %125 : vector<64x32xf32>
    %cst_68 = arith.constant dense<0.000000e+00> : vector<64xf32>
    %127 = vector.multi_reduction <add>, %126, %cst_68 [1] : vector<64x32xf32> to vector<64xf32>
    %128 = vector.shape_cast %127 : vector<64xf32> to vector<64x1xf32>
    %129 = vector.extract_strided_slice %14 {offsets = [1, 0, 0], sizes = [1, 1, 1], strides = [1, 1, 1]} : vector<3x1x1xf32> to vector<1x1x1xf32>
    %130 = vector.shape_cast %129 : vector<1x1x1xf32> to vector<1x1xf32>
    %131 = vector.broadcast %130 : vector<1x1xf32> to vector<64x1xf32>
    %132 = arith.addf %128, %131 : vector<64x1xf32>
    %cst_69 = arith.constant dense<0xFF800000> : vector<1xf32>
    %133 = vector.multi_reduction <maximumf>, %132, %cst_69 [0] : vector<64x1xf32> to vector<1xf32>
    %134 = vector.shape_cast %133 : vector<1xf32> to vector<1x1xf32>
    %135 = vector.broadcast %134 : vector<1x1xf32> to vector<64x1xf32>
    %136 = arith.subf %132, %135 : vector<64x1xf32>
    %137 = math.exp %136 : vector<64x1xf32>
    %138 = vector.broadcast %137 : vector<64x1xf32> to vector<64x32xf32>
    %139 = arith.mulf %138, %122 : vector<64x32xf32>
    %140 = tpu.concatenate %139, %137 in 1 : vector<64x32xf32>, vector<64x1xf32> -> vector<64x33xf32>
    %141 = arith.truncf %140 : vector<64x33xf32> to vector<64x33xbf16>
    %cst_70 = arith.constant dense<0.000000e+00> : vector<16x33xf32>
    %142 = tpu.matmul %24, %141, %cst_70 {dimension_numbers = #tpu.dot_dimension_numbers<[0], [0], [1], [1], [0, 1, 1, 1], [], []>} : vector<64x16xbf16>, vector<64x33xbf16>, vector<16x33xf32> -> vector<16x33xf32>
    %143 = vector.extract_strided_slice %142 {offsets = [0, 0], sizes = [16, 32], strides = [1, 1]} : vector<16x33xf32> to vector<16x32xf32>
    %144 = vector.extract_strided_slice %142 {offsets = [0, 32], sizes = [16, 1], strides = [1, 1]} : vector<16x33xf32> to vector<16x1xf32>
    %cst_71 = arith.constant 1.000000e-30 : f32
    %145 = vector.broadcast %cst_71 : f32 to vector<16x1xf32>
    %146 = arith.maximumf %144, %145 : vector<16x1xf32>
    %147 = tpu.reciprocal %146 {approx = true} : vector<16x1xf32> -> vector<16x1xf32>
    %148 = vector.broadcast %147 : vector<16x1xf32> to vector<16x32xf32>
    %149 = arith.mulf %143, %148 : vector<16x32xf32>
    %150 = arith.addf %149, %108 : vector<16x32xf32>
    %151 = vector.extract_strided_slice %15 {offsets = [1, 0, 0], sizes = [1, 1, 32], strides = [1, 1, 1]} : vector<3x1x32xf32> to vector<1x1x32xf32>
    %152 = vector.shape_cast %151 : vector<1x1x32xf32> to vector<1x32xf32>
    %153 = vector.broadcast %152 : vector<1x32xf32> to vector<16x32xf32>
    %154 = arith.addf %150, %153 : vector<16x32xf32>
    %cst_72 = arith.constant 0.000000e+00 : f32
    %155 = vector.broadcast %cst_72 : f32 to vector<16x32xf32>
    %156 = arith.cmpf ogt, %154, %155 : vector<16x32xf32>
    %cst_73 = arith.constant 2.000000e-01 : f32
    %157 = vector.broadcast %cst_73 : f32 to vector<16x32xf32>
    %158 = arith.mulf %157, %154 : vector<16x32xf32>
    %159 = arith.select %156, %154, %158 : vector<16x32xi1>, vector<16x32xf32>
    %160 = arith.addf %159, %32 : vector<16x32xf32>
    %cst_74 = arith.constant 0.000000e+00 : f32
    %161 = vector.broadcast %cst_74 : f32 to vector<16x32xf32>
    %162 = arith.maximumf %160, %161 : vector<16x32xf32>
    %163 = vector.extract_strided_slice %10 {offsets = [2, 0, 0], sizes = [1, 32, 160], strides = [1, 1, 1]} : vector<3x32x160xf32> to vector<1x32x160xf32>
    %164 = vector.shape_cast %163 : vector<1x32x160xf32> to vector<32x160xf32>
    %cst_75 = arith.constant dense<0.000000e+00> : vector<16x160xf32>
    %165 = tpu.matmul %162, %164, %cst_75 {dimension_numbers = #tpu.dot_dimension_numbers<[1], [0], [0], [1], [0, 0, 1, 1], [], []>} : vector<16x32xf32>, vector<32x160xf32>, vector<16x160xf32> -> vector<16x160xf32>
    %166 = vector.extract_strided_slice %11 {offsets = [2, 0, 0], sizes = [1, 8, 64], strides = [1, 1, 1]} : vector<3x8x64xf32> to vector<1x8x64xf32>
    %167 = vector.shape_cast %166 : vector<1x8x64xf32> to vector<8x64xf32>
    %cst_76 = arith.constant dense<0.000000e+00> : vector<64x64xf32>
    %168 = tpu.matmul %3, %167, %cst_76 {dimension_numbers = #tpu.dot_dimension_numbers<[1], [0], [0], [1], [0, 0, 1, 1], [], []>} : vector<64x8xf32>, vector<8x64xf32>, vector<64x64xf32> -> vector<64x64xf32>
    %169 = vector.extract_strided_slice %165 {offsets = [0, 0], sizes = [16, 64], strides = [1, 1]} : vector<16x160xf32> to vector<16x64xf32>
    %170 = arith.truncf %169 : vector<16x64xf32> to vector<16x64xbf16>
    %171 = vector.extract_strided_slice %165 {offsets = [0, 64], sizes = [16, 64], strides = [1, 1]} : vector<16x160xf32> to vector<16x64xf32>
    %172 = arith.truncf %171 : vector<16x64xf32> to vector<16x64xbf16>
    %173 = vector.extract_strided_slice %165 {offsets = [0, 128], sizes = [16, 32], strides = [1, 1]} : vector<16x160xf32> to vector<16x32xf32>
    %174 = tpu.concatenate %170, %172 in 0 : vector<16x64xbf16>, vector<16x64xbf16> -> vector<32x64xbf16>
    %cst_77 = arith.constant dense<0.000000e+00> : vector<64x64xf32>
    %175 = tpu.matmul %5, %174, %cst_77 {dimension_numbers = #tpu.dot_dimension_numbers<[1], [0], [0], [1], [0, 0, 1, 1], [], []>} : vector<64x32xbf16>, vector<32x64xbf16>, vector<64x64xf32> -> vector<64x64xf32>
    %176 = arith.addf %175, %168 : vector<64x64xf32>
    %177 = vector.extract_strided_slice %12 {offsets = [2, 0, 0], sizes = [1, 1, 64], strides = [1, 1, 1]} : vector<3x1x64xf32> to vector<1x1x64xf32>
    %178 = vector.shape_cast %177 : vector<1x1x64xf32> to vector<1x64xf32>
    %179 = vector.broadcast %178 : vector<1x64xf32> to vector<64x64xf32>
    %180 = arith.addf %176, %179 : vector<64x64xf32>
    %cst_78 = arith.constant 0.000000e+00 : f32
    %181 = vector.broadcast %cst_78 : f32 to vector<64x64xf32>
    %182 = arith.cmpf ogt, %180, %181 : vector<64x64xf32>
    %cst_79 = arith.constant 2.000000e-01 : f32
    %183 = vector.broadcast %cst_79 : f32 to vector<64x64xf32>
    %184 = arith.mulf %183, %180 : vector<64x64xf32>
    %185 = arith.select %182, %180, %184 : vector<64x64xi1>, vector<64x64xf32>
    %186 = vector.extract_strided_slice %185 {offsets = [0, 0], sizes = [64, 32], strides = [1, 1]} : vector<64x64xf32> to vector<64x32xf32>
    %187 = vector.extract_strided_slice %185 {offsets = [0, 32], sizes = [64, 32], strides = [1, 1]} : vector<64x64xf32> to vector<64x32xf32>
    %188 = vector.extract_strided_slice %13 {offsets = [2, 0, 0], sizes = [1, 1, 32], strides = [1, 1, 1]} : vector<3x1x32xf32> to vector<1x1x32xf32>
    %189 = vector.shape_cast %188 : vector<1x1x32xf32> to vector<1x32xf32>
    %190 = vector.broadcast %189 : vector<1x32xf32> to vector<64x32xf32>
    %191 = arith.mulf %186, %190 : vector<64x32xf32>
    %cst_80 = arith.constant dense<0.000000e+00> : vector<64xf32>
    %192 = vector.multi_reduction <add>, %191, %cst_80 [1] : vector<64x32xf32> to vector<64xf32>
    %193 = vector.shape_cast %192 : vector<64xf32> to vector<64x1xf32>
    %194 = vector.extract_strided_slice %14 {offsets = [2, 0, 0], sizes = [1, 1, 1], strides = [1, 1, 1]} : vector<3x1x1xf32> to vector<1x1x1xf32>
    %195 = vector.shape_cast %194 : vector<1x1x1xf32> to vector<1x1xf32>
    %196 = vector.broadcast %195 : vector<1x1xf32> to vector<64x1xf32>
    %197 = arith.addf %193, %196 : vector<64x1xf32>
    %cst_81 = arith.constant dense<0xFF800000> : vector<1xf32>
    %198 = vector.multi_reduction <maximumf>, %197, %cst_81 [0] : vector<64x1xf32> to vector<1xf32>
    %199 = vector.shape_cast %198 : vector<1xf32> to vector<1x1xf32>
    %200 = vector.broadcast %199 : vector<1x1xf32> to vector<64x1xf32>
    %201 = arith.subf %197, %200 : vector<64x1xf32>
    %202 = math.exp %201 : vector<64x1xf32>
    %203 = vector.broadcast %202 : vector<64x1xf32> to vector<64x32xf32>
    %204 = arith.mulf %203, %187 : vector<64x32xf32>
    %205 = tpu.concatenate %204, %202 in 1 : vector<64x32xf32>, vector<64x1xf32> -> vector<64x33xf32>
    %206 = arith.truncf %205 : vector<64x33xf32> to vector<64x33xbf16>
    %cst_82 = arith.constant dense<0.000000e+00> : vector<16x33xf32>
    %207 = tpu.matmul %24, %206, %cst_82 {dimension_numbers = #tpu.dot_dimension_numbers<[0], [0], [1], [1], [0, 1, 1, 1], [], []>} : vector<64x16xbf16>, vector<64x33xbf16>, vector<16x33xf32> -> vector<16x33xf32>
    %208 = vector.extract_strided_slice %207 {offsets = [0, 0], sizes = [16, 32], strides = [1, 1]} : vector<16x33xf32> to vector<16x32xf32>
    %209 = vector.extract_strided_slice %207 {offsets = [0, 32], sizes = [16, 1], strides = [1, 1]} : vector<16x33xf32> to vector<16x1xf32>
    %cst_83 = arith.constant 1.000000e-30 : f32
    %210 = vector.broadcast %cst_83 : f32 to vector<16x1xf32>
    %211 = arith.maximumf %209, %210 : vector<16x1xf32>
    %212 = tpu.reciprocal %211 {approx = true} : vector<16x1xf32> -> vector<16x1xf32>
    %213 = vector.broadcast %212 : vector<16x1xf32> to vector<16x32xf32>
    %214 = arith.mulf %208, %213 : vector<16x32xf32>
    %215 = arith.addf %214, %173 : vector<16x32xf32>
    %216 = vector.extract_strided_slice %15 {offsets = [2, 0, 0], sizes = [1, 1, 32], strides = [1, 1, 1]} : vector<3x1x32xf32> to vector<1x1x32xf32>
    %217 = vector.shape_cast %216 : vector<1x1x32xf32> to vector<1x32xf32>
    %218 = vector.broadcast %217 : vector<1x32xf32> to vector<16x32xf32>
    %219 = arith.addf %215, %218 : vector<16x32xf32>
    %cst_84 = arith.constant 0.000000e+00 : f32
    %220 = vector.broadcast %cst_84 : f32 to vector<16x32xf32>
    %221 = arith.cmpf ogt, %219, %220 : vector<16x32xf32>
    %cst_85 = arith.constant 2.000000e-01 : f32
    %222 = vector.broadcast %cst_85 : f32 to vector<16x32xf32>
    %223 = arith.mulf %222, %219 : vector<16x32xf32>
    %224 = arith.select %221, %219, %223 : vector<16x32xi1>, vector<16x32xf32>
    %225 = arith.addf %224, %32 : vector<16x32xf32>
    %cst_86 = arith.constant 0.000000e+00 : f32
    %226 = vector.broadcast %cst_86 : f32 to vector<16x32xf32>
    %227 = arith.maximumf %225, %226 : vector<16x32xf32>
    %cst_87 = arith.constant dense<0.000000e+00> : vector<16x32xf32>
    %228 = tpu.matmul %1, %16, %cst_87 {dimension_numbers = #tpu.dot_dimension_numbers<[1], [0], [0], [1], [0, 0, 1, 1], [], []>} : vector<16x16xf32>, vector<16x32xf32>, vector<16x32xf32> -> vector<16x32xf32>
    %cst_88 = arith.constant dense<0.000000e+00> : vector<16x32xf32>
    %229 = tpu.matmul %227, %17, %cst_88 {dimension_numbers = #tpu.dot_dimension_numbers<[1], [0], [0], [1], [0, 0, 1, 1], [], []>} : vector<16x32xf32>, vector<32x32xf32>, vector<16x32xf32> -> vector<16x32xf32>
    %230 = arith.addf %228, %229 : vector<16x32xf32>
    %231 = vector.broadcast %18 : vector<1x32xf32> to vector<16x32xf32>
    %232 = arith.addf %230, %231 : vector<16x32xf32>
    %cst_89 = arith.constant 0.000000e+00 : f32
    %233 = vector.broadcast %cst_89 : f32 to vector<16x32xf32>
    %234 = arith.cmpf ogt, %232, %233 : vector<16x32xf32>
    %cst_90 = arith.constant 2.000000e-01 : f32
    %235 = vector.broadcast %cst_90 : f32 to vector<16x32xf32>
    %236 = arith.mulf %235, %232 : vector<16x32xf32>
    %237 = arith.select %234, %232, %236 : vector<16x32xi1>, vector<16x32xf32>
    %cst_91 = arith.constant dense<0.000000e+00> : vector<16x32xf32>
    %238 = tpu.matmul %237, %19, %cst_91 {dimension_numbers = #tpu.dot_dimension_numbers<[1], [0], [0], [1], [0, 0, 1, 1], [], []>} : vector<16x32xf32>, vector<32x32xf32>, vector<16x32xf32> -> vector<16x32xf32>
    %cst_92 = arith.constant dense<0.000000e+00> : vector<16x32xf32>
    %239 = tpu.matmul %1, %20, %cst_92 {dimension_numbers = #tpu.dot_dimension_numbers<[1], [0], [0], [1], [0, 0, 1, 1], [], []>} : vector<16x16xf32>, vector<16x32xf32>, vector<16x32xf32> -> vector<16x32xf32>
    %240 = arith.addf %238, %239 : vector<16x32xf32>
    %241 = vector.broadcast %21 : vector<1x32xf32> to vector<16x32xf32>
    %242 = arith.addf %240, %241 : vector<16x32xf32>
    %cst_93 = arith.constant dense<0.000000e+00> : vector<16x1xf32>
    %243 = tpu.matmul %242, %22, %cst_93 {dimension_numbers = #tpu.dot_dimension_numbers<[1], [0], [0], [1], [0, 0, 1, 1], [], []>} : vector<16x32xf32>, vector<32x1xf32>, vector<16x1xf32> -> vector<16x1xf32>
    %244 = vector.broadcast %23 : vector<1x1xf32> to vector<16x1xf32>
    %245 = arith.addf %243, %244 : vector<16x1xf32>
    %246 = arith.truncf %245 : vector<16x1xf32> to vector<16x1xbf16>
    %cst_94 = arith.constant dense<0.000000e+00> : vector<1x1xf32>
    %247 = tpu.matmul %7, %246, %cst_94 {dimension_numbers = #tpu.dot_dimension_numbers<[1], [0], [0], [1], [0, 0, 1, 1], [], []>} : vector<1x16xbf16>, vector<16x1xbf16>, vector<1x1xf32> -> vector<1x1xf32>
    %c0_95 = arith.constant 0 : index
    %c0_96 = arith.constant 0 : index
    %c0_97 = arith.constant 0 : index
    %248 = vector.load %arg21[%c0_95, %c0_96, %c0_97] : memref<1x1x1xf32, #tpu.memory_space<vmem>>, vector<1x1x1xf32>
    %249 = vector.shape_cast %248 : vector<1x1x1xf32> to vector<1x1xf32>
    %250 = vector.shape_cast %247 : vector<1x1xf32> to vector<1x1x1xf32>
    tpu.vector_store %arg21[%c0_95, %c0_96, %c0_97], %250 {strides = array<i32>} : memref<1x1x1xf32, #tpu.memory_space<vmem>>, vector<1x1x1xf32>,
    return
  }
  func.func @transform_0(%arg0: i32) -> (i32, i32, i32) {
    %c0_i32 = arith.constant 0 : i32
    %c0_i32_0 = arith.constant 0 : i32
    %c0_i32_1 = arith.constant 0 : i32
    return %arg0, %c0_i32, %c0_i32_0 : i32, i32, i32
  }
  func.func @transform_1(%arg0: i32) -> (i32, i32, i32) {
    %c0_i32 = arith.constant 0 : i32
    %c0_i32_0 = arith.constant 0 : i32
    %c0_i32_1 = arith.constant 0 : i32
    return %arg0, %c0_i32, %c0_i32_0 : i32, i32, i32
  }
  func.func @transform_2(%arg0: i32) -> (i32, i32, i32) {
    %c0_i32 = arith.constant 0 : i32
    %c0_i32_0 = arith.constant 0 : i32
    %c0_i32_1 = arith.constant 0 : i32
    return %arg0, %c0_i32, %c0_i32_0 : i32, i32, i32
  }
  func.func @transform_3(%arg0: i32) -> (i32, i32, i32) {
    %c0_i32 = arith.constant 0 : i32
    %c0_i32_0 = arith.constant 0 : i32
    %c0_i32_1 = arith.constant 0 : i32
    return %arg0, %c0_i32, %c0_i32_0 : i32, i32, i32
  }
  func.func @transform_4(%arg0: i32) -> (i32, i32) {
    %c0_i32 = arith.constant 0 : i32
    %c0_i32_0 = arith.constant 0 : i32
    %c0_i32_1 = arith.constant 0 : i32
    return %c0_i32, %c0_i32_0 : i32, i32
  }
  func.func @transform_5(%arg0: i32) -> (i32, i32) {
    %c0_i32 = arith.constant 0 : i32
    %c0_i32_0 = arith.constant 0 : i32
    %c0_i32_1 = arith.constant 0 : i32
    return %c0_i32, %c0_i32_0 : i32, i32
  }
  func.func @transform_6(%arg0: i32) -> (i32, i32, i32) {
    %c0_i32 = arith.constant 0 : i32
    %c0_i32_0 = arith.constant 0 : i32
    %c0_i32_1 = arith.constant 0 : i32
    %c0_i32_2 = arith.constant 0 : i32
    return %c0_i32, %c0_i32_0, %c0_i32_1 : i32, i32, i32
  }
  func.func @transform_7(%arg0: i32) -> (i32, i32, i32) {
    %c0_i32 = arith.constant 0 : i32
    %c0_i32_0 = arith.constant 0 : i32
    %c0_i32_1 = arith.constant 0 : i32
    %c0_i32_2 = arith.constant 0 : i32
    return %c0_i32, %c0_i32_0, %c0_i32_1 : i32, i32, i32
  }
  func.func @transform_8(%arg0: i32) -> (i32, i32, i32) {
    %c0_i32 = arith.constant 0 : i32
    %c0_i32_0 = arith.constant 0 : i32
    %c0_i32_1 = arith.constant 0 : i32
    %c0_i32_2 = arith.constant 0 : i32
    return %c0_i32, %c0_i32_0, %c0_i32_1 : i32, i32, i32
  }
  func.func @transform_9(%arg0: i32) -> (i32, i32, i32) {
    %c0_i32 = arith.constant 0 : i32
    %c0_i32_0 = arith.constant 0 : i32
    %c0_i32_1 = arith.constant 0 : i32
    %c0_i32_2 = arith.constant 0 : i32
    return %c0_i32, %c0_i32_0, %c0_i32_1 : i32, i32, i32
  }
  func.func @transform_10(%arg0: i32) -> (i32, i32, i32) {
    %c0_i32 = arith.constant 0 : i32
    %c0_i32_0 = arith.constant 0 : i32
    %c0_i32_1 = arith.constant 0 : i32
    %c0_i32_2 = arith.constant 0 : i32
    return %c0_i32, %c0_i32_0, %c0_i32_1 : i32, i32, i32
  }
  func.func @transform_11(%arg0: i32) -> (i32, i32, i32) {
    %c0_i32 = arith.constant 0 : i32
    %c0_i32_0 = arith.constant 0 : i32
    %c0_i32_1 = arith.constant 0 : i32
    %c0_i32_2 = arith.constant 0 : i32
    return %c0_i32, %c0_i32_0, %c0_i32_1 : i32, i32, i32
  }
  func.func @transform_12(%arg0: i32) -> (i32, i32) {
    %c0_i32 = arith.constant 0 : i32
    %c0_i32_0 = arith.constant 0 : i32
    %c0_i32_1 = arith.constant 0 : i32
    return %c0_i32, %c0_i32_0 : i32, i32
  }
  func.func @transform_13(%arg0: i32) -> (i32, i32) {
    %c0_i32 = arith.constant 0 : i32
    %c0_i32_0 = arith.constant 0 : i32
    %c0_i32_1 = arith.constant 0 : i32
    return %c0_i32, %c0_i32_0 : i32, i32
  }
  func.func @transform_14(%arg0: i32) -> (i32, i32) {
    %c0_i32 = arith.constant 0 : i32
    %c0_i32_0 = arith.constant 0 : i32
    %c0_i32_1 = arith.constant 0 : i32
    return %c0_i32, %c0_i32_0 : i32, i32
  }
  func.func @transform_15(%arg0: i32) -> (i32, i32) {
    %c0_i32 = arith.constant 0 : i32
    %c0_i32_0 = arith.constant 0 : i32
    %c0_i32_1 = arith.constant 0 : i32
    return %c0_i32, %c0_i32_0 : i32, i32
  }
  func.func @transform_16(%arg0: i32) -> (i32, i32) {
    %c0_i32 = arith.constant 0 : i32
    %c0_i32_0 = arith.constant 0 : i32
    %c0_i32_1 = arith.constant 0 : i32
    return %c0_i32, %c0_i32_0 : i32, i32
  }
  func.func @transform_17(%arg0: i32) -> (i32, i32) {
    %c0_i32 = arith.constant 0 : i32
    %c0_i32_0 = arith.constant 0 : i32
    %c0_i32_1 = arith.constant 0 : i32
    return %c0_i32, %c0_i32_0 : i32, i32
  }
  func.func @transform_18(%arg0: i32) -> (i32, i32) {
    %c0_i32 = arith.constant 0 : i32
    %c0_i32_0 = arith.constant 0 : i32
    %c0_i32_1 = arith.constant 0 : i32
    return %c0_i32, %c0_i32_0 : i32, i32
  }
  func.func @transform_19(%arg0: i32) -> (i32, i32) {
    %c0_i32 = arith.constant 0 : i32
    %c0_i32_0 = arith.constant 0 : i32
    %c0_i32_1 = arith.constant 0 : i32
    return %c0_i32, %c0_i32_0 : i32, i32
  }
  func.func @transform_20(%arg0: i32) -> (i32, i32, i32) {
    %c0_i32 = arith.constant 0 : i32
    %c0_i32_0 = arith.constant 0 : i32
    %c0_i32_1 = arith.constant 0 : i32
    return %arg0, %c0_i32, %c0_i32_0 : i32, i32, i32
  }
}

</mosaic_0001>

<bundles_post_ra>
// kernel: pagtn_predictor_pallas.1
= control target key start
LH: loop header
LB: loop body
LE: loop exit
PB: predicated region body
PF: predicated region fallthrough
CT: control target
= control target key end

     0   :  { %s4015_s23 = smov 0   ;;  %s4635_s0 = inlined_call_operand.vmem [shape: f32[2,16,16], index: 0, kind: input, shape index: {}]   ;;  %s4636_s1 = inlined_call_operand.vmem [shape: f32[2,64,8], index: 1, kind: input, shape index: {}]   ;;  %s4637_s2 = inlined_call_operand.vmem [shape: bf16[2,64,32], index: 2, kind: input, shape index: {}]   ;;  %s4638_s3 = inlined_call_operand.vmem [shape: bf16[2,1,16], index: 3, kind: input, shape index: {}]   ;;  %s4639_s4 = inlined_call_operand.vmem [shape: f32[16,32], index: 4, kind: input, shape index: {}]   ;;  %s4640_s5 = inlined_call_operand.vmem [shape: f32[1,32], index: 5, kind: input, shape index: {}]   ;;  %s4641_s6 = inlined_call_operand.vmem [shape: f32[3,32,160], index: 6, kind: input, shape index: {}]   ;;  %s4642_s7 = inlined_call_operand.vmem [shape: f32[3,8,64], index: 7, kind: input, shape index: {}]   ;;  %s4643_s8 = inlined_call_operand.vmem [shape: f32[3,1,64], index: 8, kind: input, shape index: {}]   ;;  %s4644_s9 = inlined_call_operand.vmem [shape: f32[3,1,32], index: 9, kind: input, shape index: {}]   ;;  %s4645_s10 = inlined_call_operand.vmem [shape: f32[3,1,1], index: 10, kind: input, shape index: {}]   ;;  %s4646_s11 = inlined_call_operand.vmem [shape: f32[3,1,32], index: 11, kind: input, shape index: {}]   ;;  %s4647_s12 = inlined_call_operand.vmem [shape: f32[16,32], index: 12, kind: input, shape index: {}]   ;;  %s4648_s13 = inlined_call_operand.vmem [shape: f32[32,32], index: 13, kind: input, shape index: {}]   ;;  %s4649_s14 = inlined_call_operand.vmem [shape: f32[1,32], index: 14, kind: input, shape index: {}]   ;;  %s4650_s15 = inlined_call_operand.vmem [shape: f32[32,32], index: 15, kind: input, shape index: {}]   ;;  %s4651_s16 = inlined_call_operand.vmem [shape: f32[16,32], index: 16, kind: input, shape index: {}]   ;;  %s4652_s17 = inlined_call_operand.vmem [shape: f32[1,32], index: 17, kind: input, shape index: {}]   ;;  %s4653_s18 = inlined_call_operand.vmem [shape: f32[32,1], index: 18, kind: input, shape index: {}]   ;;  %s4654_s19 = inlined_call_operand.<no memory space> [shape: f32[1,1], index: 19, kind: input, shape index: {}]   ;;  %s4655_s20 = inlined_call_operand.vmem [shape: f32[2,1,1], index: 20, kind: output, shape index: {}]  }
   0x1   :  { %4662 = sst [smem:[#allocation3_spill]] %s4635_s0  ;;  %v25_v0 = vstv %s4654_s19 }
   0x2   :  { %4663 = sst [smem:[#allocation4_spill]] %s4636_s1  ;;  %26 = vst [vmem:[#allocation2] sm:$0x1] %v25_v0 }
   0x3   :  { %4664 = sst [smem:[#allocation5_spill]] %s4637_s2 }
   0x4   :  { %4665 = sst [smem:[#allocation6_spill]] %s4638_s3 }
   0x5   :  { %4666 = sst [smem:[#allocation7_spill]] %s4639_s4 }
   0x6 LB: > { %s3245_s24 = sadd.s32 4294967295, %s3898_s23   ;;  %p3249_p0 = scmp.ge.s32.totalorder %s3898_s23, 1  ;;  %s3898_s23 = sphi %s4015_s23, %s32_s23  }
   0x7   : > { %p592_p1 = scmp.lt.s32.totalorder %s3898_s23, 3 }
   0x9   : > { %p593_p2 = pnand %p3249_p0, %p592_p1 }
   0xa   : > { %s4667_s3 = sld [smem:[#allocation7_spill]] (!%p593_p2)  ;;  %p661_p3 = scmp.lt.s32.totalorder (!%p593_p2), %s3245_s24, 1  ;;  %v706_v3 = vld [vmem:[%s4641_s6 + $0x8] sm:$0xff] (!%p593_p2)  ;;  %v708_v5 = vld [vmem:[%s4641_s6 + $0x18] sm:$0xff] (!%p593_p2)  ;;  %vm769_vm0 = vcmask (!%p593_p2), 130048   ;;  %v705_v9 = vld [vmem:[%s4641_s6] sm:$0xff] (!%p593_p2) }
   0xb   : > { %596 = sbr.rel (%p593_p2) target bundleno = 5341 (0x14dd), region = 100  ;;  %v3609_v6 = vpack.c.bf16 (!%p593_p2), %v708_v5, %v706_v3  ;;  %s4668_s1 = sld [smem:[#allocation3_spill]] (!%p593_p2)  ;;  %v707_v10 = vld [vmem:[%s4641_s6 + $0x10] sm:$0xff] (!%p593_p2)  ;;  %v710_v12 = vld [vmem:[%s4641_s6 + $0x28] sm:$0xff] (!%p593_p2)  ;;  %v712_v13 = vld [vmem:[%s4641_s6 + $0x38] sm:$0xff] (!%p593_p2)  ;;  %v3900_v18 = vmov (!%p593_p2), 0.0  }
   0xc   : > { %v3611_v11 = vpack.c.bf16 (!%p593_p2), %v707_v10, %v705_v9  ;;  %v3613_v14 = vpack.c.bf16 (!%p593_p2), %v712_v13, %v710_v12  ;;  %v709_v15 = vld [vmem:[%s4641_s6 + $0x20] sm:$0xff] (!%p593_p2)  ;;  %v711_v16 = vld [vmem:[%s4641_s6 + $0x30] sm:$0xff] (!%p593_p2)  ;;  %928 = vmatprep.mubr.f32.mxu1 (!%p593_p2), %v3900_v18  ;;  %vm857_vm2 = vcmask (!%p593_p2), 261120   ;;  %vm941_vm4 = vcmask (!%p593_p2), 64512   ;;  %s4669_s29 = sld [smem:[#allocation4_spill]] (!%p593_p2)  ;;  %s4670_s2 = sld [smem:[#allocation5_spill]] (!%p593_p2) }
   0xd   : > { %3610 = vmatprep.subr.bf16.mxu1 (!%p593_p2), %v3609_v6  ;;  %v3615_v17 = vpack.c.bf16 (!%p593_p2), %v711_v16, %v709_v15  ;;  %v3256_v19 = vld [vmem:[%s4640_s5] ss:$0 sm:$0xff] (!%p593_p2)  ;;  %s4661_s19 = smov (!%p593_p2), 64   ;;  %vm1263_vm13 = vcmask (!%p593_p2), 7168   ;;  %s4659_s21 = smov (!%p593_p2), 32   ;;  %vm3905_vm14 = vmmov (!%p593_p2), 0  }
   0xe   : > { %3612 = vmatpush1.bf16.msra.mxu1 (!%p593_p2), %v3611_v11  ;;  %v729_v28 = vld [vmem:[%s4642_s7] sm:$0xff] (!%p593_p2)  ;;  %vm1445_vm15 = vcmask (!%p593_p2), 523264   ;;  %s4673_s4 = smov (!%p593_p2), 64   ;;  %s4674_s26 = sld [smem:[#allocation6_spill]] (!%p593_p2) }
   0xf   : > { %3614 = vmatprep.subr.bf16.mxu1 (!%p593_p2), %v3613_v14  ;;  %v3277_v55 = vld [vmem:[%s4643_s8] ss:$0 sm:$0xff] (!%p593_p2) }
  0x10   : > { %v702_v1 = vld [vmem:[%s4667_s3] sm:$0xff] (!%p593_p2)  ;;  %v703_v2 = vld [vmem:[%s4667_s3 + $0x8] sm:$0xff] (!%p593_p2) }
  0x11   : > { %v3605_v4 = vpack.c.bf16 (!%p593_p2), %v703_v2, %v702_v1 }
  0x12   : > { %s4676_s24 = smov (!%p661_p3, %s3245_s24), 1  ;;  %3616 = vmatpush1.bf16.msra.mxu1 %v3615_v17 }
  0x13   : > { %3606 = vmatprep.subr.bf16.mxu0 %v3605_v4  ;;  %s3336_s30 = sshll.u32 %s4676_s24, 4  ;;  %s3337_s27 = sshll.u32 %s4676_s24, 6 }
  0x14   : > { %3608 = vmatpush3.bf16.msra.mxu0 %v3605_v4  ;;  %s4041_s22 = scalar_lea.vmem %s4668_s1, %s3336_s30  ;;  %s4085_s30 = scalar_lea.vmem %s4669_s29, %s3337_s27  ;;  %v3278_v4 = vld [vmem:[%s4644_s9] ss:$0 sm:$0xff] }
  0x15   : > { %v683_v7 = vld [vmem:[%s4041_s22] sm:$0xff]  ;;  %v684_v8 = vld [vmem:[%s4041_s22 + $0x8] sm:$0xff]  ;;  %3438 = vmatprep.subr.mxu0 %v729_v28  ;;  %s3338_s0 = sshll.u32 %s4676_s24, 5  ;;  %v4097_v31 = vld [vmem:[%s4085_s30 + $0x10] sm:$0xff]  ;;  %s4657_s1 = smov 96  }
  0x16   : > { %3435 = vmatprep.mubr.msk.f32.mxu0 %vm769_vm0, %v683_v7  ;;  %v685_v29 = vld [vmem:[%s4085_s30] sm:$0xff]  ;;  %v4089_v30 = vld [vmem:[%s4085_s30 + $0x8] sm:$0xff]  ;;  %s4102_s25 = scalar_lea.vmem %s4670_s2, %s3338_s0  ;;  %v4107_v32 = vld [vmem:[%s4085_s30 + $0x18] sm:$0xff]  ;;  %s4671_s2 = smov 32  }
  0x17   : > { %3436 = vmatmul.mubr.msk.f32.vlgmr.msra.gmra.mrb[0].mxu0 %vm769_vm0, %v684_v8  ;;  %v4112_v33 = vld [vmem:[%s4102_s25] sm:$0xff]   ;;  %v4120_v35 = vld [vmem:[%s4085_s30 + $0x28] sm:$0xff]  ;;  %v4123_v36 = vld [vmem:[%s4085_s30 + $0x30] sm:$0xff]  ;;  %s678_s27 = scalar_lea.vmem %s4674_s26, %s4676_s24 }
  0x18   : > { %3439 = vmatpush3.msra.mxu0 %v729_v28  ;;  %3440 = vmatprep.mubr.msk.f32.mxu0 %vm941_vm4, %v685_v29  ;;  %v4117_v34 = vld [vmem:[%s4085_s30 + $0x20] sm:$0xff]  ;;  %v4134_v39 = vld [vmem:[%s4085_s30 + $0x38] sm:$0xff]  ;;  %v4142_v46 = vld [vmem:[%s4102_s25 + $0x8] sm:$0xff]  }
  0x19   : > { %3464 = vmatprep.subr.bf16.mxu0 %v3900_v18  ;;  %v4145_v47 = vld [vmem:[%s4102_s25 + $0x10] sm:$0xff]   ;;  %v4152_v48 = vld [vmem:[%s4102_s25 + $0x18] sm:$0xff]  }
  0x1b   : > { %3441 = vmatmul.mubr.msk.f32.vlgmr.msra.gmra.mrb[2].mxu0 %vm941_vm4, %v4089_v30 }
  0x1c   : > { %3443 = vmatprep.mubr.msk.f32.mxu0 %vm941_vm4, %v4097_v31 }
  0x1f   : > { %3444 = vmatmul.mubr.msk.f32.gmra.mrb[4].mxu0 %vm941_vm4, %v4107_v32 }
  0x20   : > { %3446 = vmatprep.mubr.msk.f32.mxu0 %vm941_vm4, %v4117_v34 }
  0x23   : > { %3447 = vmatmul.mubr.msk.f32.gmra.mrb[6].mxu0 %vm941_vm4, %v4120_v35 }
  0x24   : > { %3449 = vmatprep.mubr.msk.f32.mxu0 %vm941_vm4, %v4123_v36 }
  0x27   : > { %3450 = vmatmul.mubr.msk.f32.gmra.mrb[8].mxu0 %vm941_vm4, %v4134_v39 }
  0x28   : > { %3472 = vmatprep.mubr.msk.bf16.mxu0 %vm3905_vm14, %v3900_v18 }
  0xea   : > { %v3437_v20 = vpop.f32.mrb[0].mxu0 }
  0xeb   : > { %v842_v21 = vpop.f32.mrb[1].mxu0  ;;  %v848_v22 = vadd.f32 %v3437_v20, %v3256_v19 }
  0xec   : > { %v843_v23 = vadd.f32 %v3256_v19, %v842_v21 }
  0xed   : > { %v854_v25 = vmul.f32 0.2, %v848_v22  ;;  %vm852_vm3 = vcmp.gt.f32.partialorder %v848_v22, 0.0 }
  0xee   : > { %vm851_vm1 = vcmp.gt.f32.partialorder %v843_v23, 0.0  ;;  %v853_v24 = vmul.f32 0.2, %v843_v23  ;;  %v3442_v43 = vpop.f32.mrb[2].mxu0 }
  0xef   : > { %v4074_v27 = vsel %vm852_vm3, %v848_v22, %v854_v25  ;;  %v1032_v44 = vpop.f32.mrb[3].mxu0 }
  0xf0   : > { %v4069_v26 = vsel %vm851_vm1, %v843_v23, %v853_v24 }
  0xf1   : > { %3259 = vmatmul.mubr.msk.f32.vlgmr.msra.gmra.mrb[0].mxu1 %vm857_vm2, %v4069_v26 }
  0xf2   : > { %934 = vmatprep.mubr.f32.mxu1 %v3900_v18  ;;  %v3445_v49 = vpop.f32.mrb[4].mxu0 }
  0xf3   : > { %v1042_v50 = vpop.f32.mrb[5].mxu0 }
  0xf5   : > { %3260 = vmatmul.mubr.msk.f32.gmra.mrb[2].mxu1 %vm857_vm2, %v4074_v27 }
  0xf6   : > { %3456 = vmatprep.mubr.msk.bf16.mxu1 %vm857_vm2, %v4112_v33  ;;  %v3448_v51 = vpop.f32.mrb[6].mxu0 }
  0xf7   : > { %v1052_v52 = vpop.f32.mrb[7].mxu0 }
  0xfa   : > { %v3451_v53 = vpop.f32.mrb[8].mxu0 }
  0xfb   : > { %v1062_v54 = vpop.f32.mrb[9].mxu0 }
 0x1c4   : > { %v930_v37 = vpop.f32.mrb[0].mxu1 }
 0x1c5   : > { %v4129_v38 = vpop.f32.mrb[1].mxu1 }
 0x1c8   : > { %v936_v40 = vpop.f32.mrb[2].mxu1 }
 0x1c9   : > { %v1071_v41 = vpack.c.bf16 %v936_v40, %v930_v37  ;;  %v4138_v42 = vpop.f32.mrb[3].mxu1 }
 0x1cb   : > { %1073 = vrot.lane.b32.xlu0 %v1071_v41, %s4661_s19  ;;  %3452 = vmatprep.subr.bf16.mxu1 %v1071_v41 }
 0x1cc   : > { %3453 = vmatpush3.bf16.msra.mxu1 %v1071_v41 }
 0x23d   : > { %v1074_v45 = vpop.permute.xlu0 %1073 }
 0x23e   : > { %3454 = vmatprep.subr.bf16.mxu1 %v1074_v45 }
 0x23f   : > { %3455 = vmatpush3.bf16.msra.mxu1 %v1074_v45 }
 0x242   : > { %3457 = vmatmul.mubr.msk.bf16.vlgmr.msra.gmra.mrb[4].mxu1 %vm857_vm2, %v4142_v46 }
 0x243   : > { %3460 = vmatprep.mubr.msk.bf16.mxu1 %vm857_vm2, %v4145_v47 }
 0x24a   : > { %3461 = vmatmul.mubr.msk.bf16.gmra.mrb[8].mxu1 %vm857_vm2, %v4152_v48 }
 0x24b   : > { %3478 = vmatprep.mubr.msk.f32.mxu1 %vm941_vm4, %v685_v29 }
 0x315   : > { %v3458_v56 = vpop.f32.mrb[4].mxu1 }
 0x316   : > { %v1151_v57 = vadd.f32 %v3458_v56, %v1042_v50  ;;  %v1142_v58 = vpop.f32.mrb[5].mxu1 }
 0x317   : > { %v1143_v59 = vadd.f32 %v1142_v58, %v1032_v44  ;;  %v3459_v60 = vpop.f32.mrb[6].mxu1 }
 0x318   : > { %v1181_v61 = vadd.f32 %v3277_v55, %v1151_v57  ;;  %v1154_v62 = vadd.f32 %v3459_v60, %v3445_v49  ;;  %v1145_v63 = vpop.f32.mrb[7].mxu1 }
 0x319   : > { %v1179_v0 = vadd.f32 %v3277_v55, %v1143_v59  ;;  %v1146_v1 = vadd.f32 %v3442_v43, %v1145_v63 }
 0x31a   : > { %v1197_v2 = vmul.f32 0.2, %v1181_v61  ;;  %v1182_v3 = vadd.f32 %v3277_v55, %v1154_v62  ;;  %vm1189_vm5 = vcmp.gt.f32.partialorder %v1181_v61, 0.0 }
 0x31b   : > { %v1195_v5 = vmul.f32 0.2, %v1179_v0  ;;  %v1180_v6 = vadd.f32 %v3277_v55, %v1146_v1  ;;  %vm1187_vm6 = vcmp.gt.f32.partialorder %v1179_v0, 0.0  ;;  %v3902_v1 = vmov 0  }
 0x31c   : > { %v1198_v7 = vmul.f32 0.2, %v1182_v3  ;;  %v4163_v8 = vsel %vm1189_vm5, %v1181_v61, %v1197_v2  ;;  %vm1190_vm7 = vcmp.gt.f32.partialorder %v1182_v3, 0.0  ;;  %3685 = vset.pattern.permute.xlu0 %v3902_v1  ;;  %3684 = vset.pattern.permute.xlu1 %v3902_v1 }
 0x31d   : > { %v1196_v9 = vmul.f32 0.2, %v1180_v6  ;;  %v3462_v10 = vpop.f32.mrb[8].mxu1  ;;  %v1219_v11 = vmul.f32 %v3278_v4, %v4163_v8  ;;  %v4166_v12 = vsel %vm1187_vm6, %v1179_v0, %v1195_v5  ;;  %vm1188_vm8 = vcmp.gt.f32.partialorder %v1180_v6, 0.0 }
 0x31e   : > { %v1167_v13 = vadd.f32 %v3462_v10, %v1062_v54  ;;  %v1158_v14 = vpop.f32.mrb[9].mxu1  ;;  %v1217_v15 = vmul.f32 %v3278_v4, %v4166_v12  ;;  %v4169_v16 = vsel %vm1190_vm7, %v1182_v3, %v1198_v7 }
 0x31f   : > { %v1159_v17 = vadd.f32 %v1158_v14, %v1052_v52  ;;  %v3463_v19 = vpop.f32.mrb[10].mxu1  ;;  %v1231_v20 = vsel %vm857_vm2, %v1219_v11, 0.0  ;;  %v1220_v21 = vmul.f32 %v3278_v4, %v4169_v16  ;;  %v4174_v28 = vsel %vm1188_vm8, %v1180_v6, %v1196_v9  ;;  %v3279_v9 = vld [vmem:[%s4645_s10] ss:$0 sm:$0xff] }
 0x320   : > { %v1185_v22 = vadd.f32 %v3277_v55, %v1167_v13  ;;  %v1170_v23 = vadd.f32 %v3463_v19, %v3451_v53  ;;  %1232 = vadd.xlane.f32.xlu1 %v1231_v20  ;;  %v1161_v24 = vpop.f32.mrb[11].mxu1  ;;  %v1225_v25 = vsel %vm857_vm2, %v1217_v15, 0.0  ;;  %v1218_v43 = vmul.f32 %v3278_v4, %v4174_v28 }
 0x321   : > { %v1183_v29 = vadd.f32 %v3277_v55, %v1159_v17  ;;  %v1162_v37 = vadd.f32 %v3448_v51, %v1161_v24  ;;  %1226 = vadd.xlane.f32.xlu0 %v1225_v25  ;;  %v1234_v41 = vsel %vm857_vm2, %v1220_v21, 0.0 }
 0x322   : > { %v1201_v40 = vmul.f32 0.2, %v1185_v22  ;;  %vm1193_vm9 = vcmp.gt.f32.partialorder %v1185_v22, 0.0  ;;  %v1228_v50 = vsel %vm857_vm2, %v1218_v43, 0.0  ;;  %v1186_v53 = vadd.f32 %v3277_v55, %v1170_v23 }
 0x323   : > { %v1199_v44 = vmul.f32 0.2, %v1183_v29  ;;  %v1184_v45 = vadd.f32 %v3277_v55, %v1162_v37  ;;  %vm1191_vm10 = vcmp.gt.f32.partialorder %v1183_v29, 0.0 }
 0x324   : > { %1235 = vadd.xlane.f32.xlu1 %v1234_v41  ;;  %v4178_v49 = vsel %vm1193_vm9, %v1185_v22, %v1201_v40  ;;  %v1202_v58 = vmul.f32 0.2, %v1186_v53  ;;  %vm1194_vm12 = vcmp.gt.f32.partialorder %v1186_v53, 0.0 }
 0x325   : > { %v1223_v52 = vmul.f32 %v3278_v4, %v4178_v49  ;;  %v1200_v54 = vmul.f32 0.2, %v1184_v45  ;;  %v4182_v51 = vsel %vm1191_vm10, %v1183_v29, %v1199_v44  ;;  %vm1192_vm11 = vcmp.gt.f32.partialorder %v1184_v45, 0.0 }
 0x326   : > { %v1221_v57 = vmul.f32 %v3278_v4, %v4182_v51  ;;  %v4190_v55 = vsel %vm1194_vm12, %v1186_v53, %v1202_v58 }
 0x327   : > { %v1243_v56 = vsel %vm857_vm2, %v1223_v52, 0.0  ;;  %v4186_v59 = vsel %vm1192_vm11, %v1184_v45, %v1200_v54  ;;  %v1224_v63 = vmul.f32 %v3278_v4, %v4190_v55 }
 0x328   : > { %1229 = vadd.xlane.f32.xlu1 %v1228_v50  ;;  %v1237_v60 = vsel %vm857_vm2, %v1221_v57, 0.0  ;;  %v1222_v61 = vmul.f32 %v3278_v4, %v4186_v59 }
 0x329   : > { %v1246_v0 = vsel %vm857_vm2, %v1224_v63, 0.0 }
 0x32a   : > { %v1240_v62 = vsel %vm857_vm2, %v1222_v61, 0.0 }
 0x32c   : > { %1244 = vadd.xlane.f32.xlu1 %v1243_v56 }
 0x330   : > { %1238 = vadd.xlane.f32.xlu1 %v1237_v60 }
 0x334   : > { %1241 = vadd.xlane.f32.xlu1 %v1240_v62 }
 0x338   : > { %1247 = vadd.xlane.f32.xlu1 %v1246_v0 }
 0x3ad   : > { %v1233_v2 = vpop.xlane.xlu1 %1232 }
 0x3ae   : > { %v1227_v10 = vpop.xlane.xlu0 %1226  ;;  %v1257_v17 = vadd.f32 %v3279_v9, %v1233_v2 }
 0x3af   : > { %v1255_v19 = vadd.f32 %v3279_v9, %v1227_v10 }
 0x3b0   : > { %v1266_v40 = vsel %vm1263_vm13, %v1257_v17, -inf }
 0x3b1   : > { %v1236_v3 = vpop.xlane.xlu1 %1235  ;;  %v1264_v41 = vsel %vm1263_vm13, %v1255_v19, -inf }
 0x3b2   : > { %v1258_v20 = vadd.f32 %v3279_v9, %v1236_v3 }
 0x3b4   : > { %v1267_v43 = vsel %vm1263_vm13, %v1258_v20, -inf }
 0x3b5   : > { %v1230_v5 = vpop.xlane.xlu1 %1229 }
 0x3b6   : > { %v1256_v11 = vadd.f32 %v3279_v9, %v1230_v5 }
 0x3b8   : > { %v1265_v23 = vsel %vm1263_vm13, %v1256_v11, -inf }
 0x3b9   : > { %v1245_v6 = vpop.xlane.xlu1 %1244 }
 0x3ba   : > { %v1261_v13 = vadd.f32 %v3279_v9, %v1245_v6 }
 0x3bc   : > { %v1272_v24 = vsel %vm1263_vm13, %v1261_v13, -inf }
 0x3bd   : > { %v1239_v7 = vpop.xlane.xlu1 %1238  ;;  %v1273_v45 = vmax.f32 %v1266_v40, %v1272_v24 }
 0x3be   : > { %v1259_v14 = vadd.f32 %v3279_v9, %v1239_v7 }
 0x3c0   : > { %v1268_v25 = vsel %vm1263_vm13, %v1259_v14, -inf }
 0x3c1   : > { %v1242_v4 = vpop.xlane.xlu1 %1241  ;;  %v1269_v50 = vmax.f32 %v1264_v41, %v1268_v25 }
 0x3c2   : > { %v1260_v15 = vadd.f32 %v3279_v9, %v1242_v4 }
 0x3c4   : > { %v1270_v21 = vsel %vm1263_vm13, %v1260_v15, -inf }
 0x3c5   : > { %v1248_v22 = vpop.xlane.xlu1 %1247  ;;  %v1271_v37 = vmax.f32 %v1265_v23, %v1270_v21 }
 0x3c6   : > { %v1262_v29 = vadd.f32 %v3279_v9, %v1248_v22 }
 0x3c7   : > { %v1276_v53 = vmax.f32 %v1269_v50, %v1271_v37 }
 0x3c8   : > { %v1274_v44 = vsel %vm1263_vm13, %v1262_v29, -inf }
 0x3c9   : > { %v1275_v52 = vmax.f32 %v1267_v43, %v1274_v44 }
 0x3cb   : > { %v1277_v54 = vmax.f32 %v1273_v45, %v1275_v52 }
 0x3cd   : > { %v1278_v56 = vmax.f32 %v1276_v53, %v1277_v54 }
 0x3cf   : > { %v1279_v57 = vrot.slane %v1278_v56, 4 }
 0x3d1   : > { %v1280_v58 = vmax.f32 %v1278_v56, %v1279_v57 }
 0x3d3   : > { %v1281_v60 = vrot.slane %v1280_v58, 2 }
 0x3d5   : > { %v1282_v61 = vmax.f32 %v1280_v58, %v1281_v60 }
 0x3d7   : > { %v1283_v62 = vrot.slane %v1282_v61, 1 }
 0x3d9   : > { %v1284_v63 = vmax.f32 %v1282_v61, %v1283_v62 }
 0x3db   : > { %v1286_v0 = vsub.f32 %v1256_v11, %v1284_v63  ;;  %v1285_v2 = vsub.f32 %v1255_v19, %v1284_v63  ;;  %v1287_v3 = vsub.f32 %v1257_v17, %v1284_v63  ;;  %v1288_v5 = vsub.f32 %v1258_v20, %v1284_v63 }
 0x3dc   : > { %v1289_v6 = vsub.f32 %v1259_v14, %v1284_v63  ;;  %v1290_v10 = vsub.f32 %v1260_v15, %v1284_v63  ;;  %v1292_v22 = vsub.f32 %v1262_v29, %v1284_v63  ;;  %v1291_v25 = vsub.f32 %v1261_v13, %v1284_v63 }
 0x3dd   : > { %v1295_v7 = vmul.f32 1.442695, %v1286_v0  ;;  %v1293_v9 = vmul.f32 1.442695, %v1285_v2  ;;  %v1297_v4 = vmul.f32 1.442695, %v1287_v3 }
 0x3de   : > { %v1299_v21 = vmul.f32 1.442695, %v1288_v5  ;;  %v1301_v23 = vmul.f32 1.442695, %v1289_v6  ;;  %v1303_v24 = vmul.f32 1.442695, %v1290_v10 }
 0x3df   : > { %3818 = vpow2.f32 %v1295_v7  ;;  %v1307_v37 = vmul.f32 1.442695, %v1292_v22  ;;  %v1305_v11 = vmul.f32 1.442695, %v1291_v25 }
 0x3e0   : > { %3820 = vpow2.f32 %v1293_v9 }
 0x3e1   : > { %3822 = vpow2.f32 %v1297_v4 }
 0x3e2   : > { %3824 = vpow2.f32 %v1299_v21 }
 0x3e3   : > { %3826 = vpow2.f32 %v1301_v23 }
 0x3e4   : > { %3828 = vpow2.f32 %v1303_v24 }
 0x3e5   : > { %3830 = vpow2.f32 %v1307_v37 }
 0x3e6   : > { %3832 = vpow2.f32 %v1305_v11 }
 0x3e9   : > { %v3819_v14 = vpop.eup %3818 }
 0x3ea   : > { %v3821_v17 = vpop.eup %3820  ;;  %1316 = vperm.xlu0 %3685, %v3819_v14  }
 0x3eb   : > { %v3823_v15 = vpop.eup %3822  ;;  %1311 = vperm.xlu1 %3684, %v3821_v17   ;;  %v3686_v45 = vpack.i.bf16 %v3819_v14, %v3821_v17 }
 0x3ec   : > { %v3825_v19 = vpop.eup %3824 }
 0x3ed   : > { %v3827_v20 = vpop.eup %3826  ;;  %v3691_v29 = vpack.i.bf16 %v3825_v19, %v3823_v15 }
 0x3ee   : > { %v3829_v40 = vpop.eup %3828 }
 0x3ef   : > { %3692 = vrot.lane.b32.xlu0 %v3691_v29, %s4659_s21  ;;  %1321 = vperm.xlu1 %3684, %v3823_v15   ;;  %v3831_v13 = vpop.eup %3830  ;;  %v3696_v41 = vpack.i.bf16 %v3829_v40, %v3827_v20 }
 0x3f0   : > { %v3833_v43 = vpop.eup %3832 }
 0x3f1   : > { %v3701_v44 = vpack.i.bf16 %v3831_v13, %v3833_v43 }
 0x3f3   : > { %3697 = vrot.lane.b32.xlu0 %v3696_v41, %s4659_s21  ;;  %1326 = vperm.xlu1 %3684, %v3825_v19  }
 0x3f7   : > { %3702 = vrot.lane.b32.xlu0 %v3701_v44, %s4659_s21  ;;  %1331 = vperm.xlu1 %3684, %v3827_v20  }
 0x3fb   : > { %1336 = vperm.xlu1 %3684, %v3829_v40  }
 0x3ff   : > { %1341 = vperm.xlu1 %3684, %v3833_v43  }
 0x403   : > { %1346 = vperm.xlu1 %3684, %v3831_v13  }
 0x407   : > { %3687 = vrot.lane.b32.xlu1 %v3686_v45, %s4659_s21  ;;  %s4672_s21 = smov 96  }
 0x469   : > { %v1317_v50 = vpop.permute.xlu0 %1316 }
 0x46a   : > { %v1350_v52 = vmul.f32 %v1317_v50, %v4174_v28  ;;  %v1312_v53 = vpop.permute.xlu1 %1311 }
 0x46b   : > { %v1349_v54 = vmul.f32 %v1312_v53, %v4166_v12 }
 0x46d   : > { %v3706_v56 = vpack.i.bf16 %v1350_v52, %v1349_v54  ;;  %v3693_v22 = vpop.permute.xlu0 %3692 }
 0x46e   : > { %v1322_v57 = vpop.permute.xlu1 %1321  ;;  %v3695_v24 = vunpack.i.h.bf16 %v3693_v22  ;;  %v3694_v25 = vunpack.i.l.bf16 %v3693_v22  ;;  %v719_v22 = vld [vmem:[%s4641_s6 + $0x70] sm:$0xff] }
 0x46f   : > { %3707 = vrot.lane.b32.xlu1 %v3706_v56, %s4657_s1  ;;  %v1351_v60 = vmul.f32 %v1322_v57, %v4163_v8 }
 0x471   : > { %v3698_v19 = vpop.permute.xlu0 %3697 }
 0x472   : > { %v1327_v58 = vpop.permute.xlu1 %1326  ;;  %v3700_v29 = vunpack.i.h.bf16 %v3698_v19  ;;  %v3699_v40 = vunpack.i.l.bf16 %v3698_v19 }
 0x473   : > { %v1352_v61 = vmul.f32 %v1327_v58, %v4169_v16 }
 0x475   : > { %v3711_v62 = vpack.i.bf16 %v1352_v61, %v1351_v60  ;;  %v3703_v50 = vpop.permute.xlu0 %3702 }
 0x476   : > { %v1332_v63 = vpop.permute.xlu1 %1331  ;;  %v3705_v53 = vunpack.i.h.bf16 %v3703_v50  ;;  %v3704_v54 = vunpack.i.l.bf16 %v3703_v50 }
 0x477   : > { %3712 = vrot.lane.b32.xlu1 %v3711_v62, %s4657_s1  ;;  %v1353_v28 = vmul.f32 %v1332_v63, %v4182_v51  ;;  %v3906_v63 = vmov 32  }
 0x478   : > { %3726 = vset.pattern.permute.xlu0 %v3906_v63 }
 0x47a   : > { %v1337_v0 = vpop.permute.xlu1 %1336 }
 0x47b   : > { %v1354_v2 = vmul.f32 %v1337_v0, %v4186_v59 }
 0x47d   : > { %v3716_v12 = vpack.i.bf16 %v1354_v2, %v1353_v28 }
 0x47e   : > { %v1342_v3 = vpop.permute.xlu1 %1341 }
 0x47f   : > { %3717 = vrot.lane.b32.xlu1 %v3716_v12, %s4657_s1  ;;  %v1355_v16 = vmul.f32 %v1342_v3, %v4178_v49 }
 0x482   : > { %v1347_v8 = vpop.permute.xlu1 %1346 }
 0x483   : > { %v1356_v5 = vmul.f32 %v1347_v8, %v4190_v55 }
 0x485   : > { %v3721_v6 = vpack.i.bf16 %v1356_v5, %v1355_v16 }
 0x486   : > { %v3688_v51 = vpop.permute.xlu1 %3687 }
 0x487   : > { %3722 = vrot.lane.b32.xlu1 %v3721_v6, %s4657_s1  ;;  %v3690_v7 = vunpack.i.h.bf16 %v3688_v51  ;;  %v3689_v9 = vunpack.i.l.bf16 %v3688_v51  ;;  %v714_v6 = vld [vmem:[%s4641_s6 + $0x48] sm:$0xff]  ;;  %v716_v51 = vld [vmem:[%s4641_s6 + $0x58] sm:$0xff] }
 0x4aa   : > { %1429 = vxpose.xlu1.c.b16.start [1/4] (short) (narrow) %v4112_v33, 16 }
 0x4ae   : > { %1430 = vxpose.xlu1.c.b16.cont [2/4] (short) (narrow) %v4142_v46, 16 }
 0x4b2   : > { %1431 = vxpose.xlu1.c.b16.cont [3/4] (short) (narrow) %v4145_v47, 16 }
 0x4b6   : > { %1432 = vxpose.xlu1.c.b16.end [4/4] (short) (narrow) %v4152_v48, 16 }
 0x4e1   : > { %v3708_v59 = vpop.permute.xlu1 %3707 }
 0x4e2   : > { %v3710_v10 = vunpack.i.h.bf16 %v3708_v59  ;;  %v3709_v4 = vunpack.i.l.bf16 %v3708_v59  ;;  %v3617_v59 = vpack.c.bf16 %v716_v51, %v714_v6 }
 0x4e4   : > { %v1413_v49 = vsel %vm857_vm2, %v3709_v4, %v3689_v9  ;;  %v1414_v55 = vsel %vm857_vm2, %v3710_v10, %v3690_v7  ;;  %v713_v7 = vld [vmem:[%s4641_s6 + $0x40] sm:$0xff]  ;;  %v715_v9 = vld [vmem:[%s4641_s6 + $0x50] sm:$0xff]  ;;  %v718_v4 = vld [vmem:[%s4641_s6 + $0x68] sm:$0xff] }
 0x4e5   : > { %v1421_v21 = vpack.c.bf16 %v1414_v55, %v1413_v49  ;;  %v3619_v10 = vpack.c.bf16 %v715_v9, %v713_v7  ;;  %v720_v49 = vld [vmem:[%s4641_s6 + $0x78] sm:$0xff]  ;;  %v717_v55 = vld [vmem:[%s4641_s6 + $0x60] sm:$0xff] }
 0x4e7   : > { %3465 = vmatpush3.bf16.msra.mxu0 %v1421_v21  ;;  %v3621_v21 = vpack.c.bf16 %v720_v49, %v718_v4 }
 0x4e8   : > { %3466 = vmatprep.subr.bf16.mxu0 %v3900_v18 }
 0x4e9   : > { %v3713_v23 = vpop.permute.xlu1 %3712 }
 0x4ea   : > { %v3715_v37 = vunpack.i.h.bf16 %v3713_v23  ;;  %v3714_v11 = vunpack.i.l.bf16 %v3713_v23  ;;  %v3623_v23 = vpack.c.bf16 %v719_v22, %v717_v55 }
 0x4ec   : > { %v1416_v14 = vsel %vm857_vm2, %v3715_v37, %v3695_v24  ;;  %v1415_v17 = vsel %vm857_vm2, %v3714_v11, %v3694_v25  ;;  %v3281_v37 = vld [vmem:[%s4646_s11] ss:$0 sm:$0xff] }
 0x4ed   : > { %v1422_v15 = vpack.c.bf16 %v1416_v14, %v1415_v17 }
 0x4ef   : > { %3467 = vmatpush3.bf16.msra.mxu0 %v1422_v15 }
 0x4f0   : > { %3468 = vmatprep.subr.bf16.mxu0 %v3900_v18 }
 0x4f1   : > { %v3718_v20 = vpop.permute.xlu1 %3717 }
 0x4f2   : > { %v3720_v13 = vunpack.i.h.bf16 %v3718_v20  ;;  %v3719_v41 = vunpack.i.l.bf16 %v3718_v20 }
 0x4f4   : > { %v1418_v43 = vsel %vm857_vm2, %v3720_v13, %v3700_v29  ;;  %v1417_v44 = vsel %vm857_vm2, %v3719_v41, %v3699_v40 }
 0x4f5   : > { %v1423_v45 = vpack.c.bf16 %v1418_v43, %v1417_v44 }
 0x4f7   : > { %3469 = vmatpush3.bf16.msra.mxu0 %v1423_v45 }
 0x4f8   : > { %3470 = vmatprep.subr.bf16.mxu0 %v3900_v18 }
 0x4f9   : > { %v3723_v52 = vpop.permute.xlu1 %3722 }
 0x4fa   : > { %v3725_v56 = vunpack.i.h.bf16 %v3723_v52  ;;  %v3724_v57 = vunpack.i.l.bf16 %v3723_v52 }
 0x4fc   : > { %v1420_v58 = vsel %vm857_vm2, %v3725_v56, %v3705_v53  ;;  %v1419_v60 = vsel %vm857_vm2, %v3724_v57, %v3704_v54 }
 0x4fd   : > { %v1424_v61 = vpack.c.bf16 %v1420_v58, %v1419_v60  ;;  %v3296_v58 = vld [vmem:[%s4643_s8 + $0x1] ss:$0 sm:$0xff] }
 0x4ff   : > { %3471 = vmatpush3.bf16.msra.mxu0 %v1424_v61 }
 0x500   : > { %3618 = vmatprep.subr.bf16.mxu0 %v3617_v59 }
 0x510   : > { %v4241_v62 = vpop.trf.xlu1 }
 0x511   : > { %3473 = vmatmul.mubr.msk.bf16.vlgmr.msra.gmra.mrb[12].mxu0 %vm1445_vm15, %v4241_v62 }
 0x512   : > { %1596 = vmatprep.mubr.f32.mxu0 %v3900_v18  ;;  %3620 = vmatpush1.bf16.msra.mxu0 %v3619_v10 }
 0x513   : > { %3622 = vmatprep.subr.bf16.mxu0 %v3621_v21 }
 0x516   : > { %3624 = vmatpush1.bf16.msra.mxu0 %v3623_v23 }
 0x5e4   : > { %v1483_v0 = vpop.f32.mrb[12].mxu0 }
 0x5e5   : > { %v1490_v28 = vmax.f32 %v1483_v0, 1e-30  ;;  %v3474_v2 = vpop.f32.mrb[13].mxu0 }
 0x5e6   : > { %v1486_v12 = vpop.f32.mrb[14].mxu0 }
 0x5e7   : > { %3834 = vrcp.f32 %v1490_v28  ;;  %v1491_v3 = vmax.f32 %v1486_v12, 1e-30  ;;  %v3475_v8 = vpop.f32.mrb[15].mxu0 }
 0x5e9   : > { %3836 = vrcp.f32 %v1491_v3 }
 0x5f1   : > { %v3835_v16 = vpop.eup %3834 }
 0x5f2   : > { %1496 = vperm.xlu0 %3726, %v3835_v16  }
 0x5f3   : > { %v3837_v5 = vpop.eup %3836 }
 0x5f6   : > { %1501 = vperm.xlu0 %3726, %v3837_v5   ;;  %v3297_v5 = vld [vmem:[%s4644_s9 + $0x1] ss:$0 sm:$0xff] }
 0x5fa   : > { %3727 = vset.pattern.permute.xlu0 %v3902_v1 }
 0x671   : > { %v1497_v24 = vpop.permute.xlu0 %1496 }
 0x672   : > { %v1504_v25 = vmul.f32 %v1497_v24, %v1483_v0 }
 0x674   : > { %v1506_v11 = vadd.f32 %v1504_v25, %v4129_v38 }
 0x675   : > { %v1502_v14 = vpop.permute.xlu0 %1501 }
 0x676   : > { %v1514_v17 = vadd.f32 %v3281_v37, %v1506_v11  ;;  %v1505_v15 = vmul.f32 %v1502_v14, %v1486_v12 }
 0x678   : > { %vm1516_vm1 = vcmp.gt.f32.partialorder %v1514_v17, 0.0  ;;  %v1518_v19 = vmul.f32 0.2, %v1514_v17  ;;  %v1507_v20 = vadd.f32 %v1505_v15, %v4138_v42  ;;  %v730_v42 = vld [vmem:[%s4642_s7 + $0x8] sm:$0xff] }
 0x679   : > { %3476 = vmatprep.subr.mxu1 %v730_v42 }
 0x67a   : > { %v1520_v29 = vsel %vm1516_vm1, %v1514_v17, %v1518_v19  ;;  %v1515_v40 = vadd.f32 %v3281_v37, %v1507_v20  ;;  %3477 = vmatpush3.msra.mxu1 %v730_v42 }
 0x67b   : > { %v1522_v13 = vadd.f32 %v1520_v29, %v4069_v26  ;;  %3479 = vmatmul.mubr.msk.f32.vlgmr.msra.gmra.mrb[12].mxu1 %vm941_vm4, %v4089_v30  ;;  %3502 = vmatprep.subr.bf16.mxu1 %v3900_v18 }
 0x67c   : > { %vm1517_vm3 = vcmp.gt.f32.partialorder %v1515_v40, 0.0  ;;  %v1519_v41 = vmul.f32 0.2, %v1515_v40  ;;  %3481 = vmatprep.mubr.msk.f32.mxu1 %vm941_vm4, %v4097_v31 }
 0x67d   : > { %v1524_v43 = vmax.f32 %v1522_v13, 0.0 }
 0x67e   : > { %v1521_v44 = vsel %vm1517_vm3, %v1515_v40, %v1519_v41 }
 0x67f   : > { %3282 = vmatmul.mubr.msk.f32.vlgmr.msra.gmra.mrb[10].mxu0 %vm857_vm2, %v1524_v43  ;;  %v1523_v45 = vadd.f32 %v1521_v44, %v4074_v27  ;;  %3482 = vmatmul.mubr.msk.f32.gmra.mrb[14].mxu1 %vm941_vm4, %v4107_v32 }
 0x680   : > { %1602 = vmatprep.mubr.f32.mxu0 %v3900_v18  ;;  %3484 = vmatprep.mubr.msk.f32.mxu1 %vm941_vm4, %v4117_v34 }
 0x681   : > { %v1525_v38 = vmax.f32 %v1523_v45, 0.0 }
 0x683   : > { %3283 = vmatmul.mubr.msk.f32.gmra.mrb[16].mxu0 %vm857_vm2, %v1525_v38  ;;  %3485 = vmatmul.mubr.msk.f32.gmra.mrb[16].mxu1 %vm941_vm4, %v4120_v35 }
 0x684   : > { %3494 = vmatprep.mubr.msk.bf16.mxu0 %vm857_vm2, %v4112_v33  ;;  %3487 = vmatprep.mubr.msk.f32.mxu1 %vm941_vm4, %v4123_v36 }
 0x687   : > { %3488 = vmatmul.mubr.msk.f32.gmra.mrb[18].mxu1 %vm941_vm4, %v4134_v39 }
 0x688   : > { %3510 = vmatprep.mubr.msk.bf16.mxu1 %vm3905_vm14, %v3900_v18 }
 0x74e   : > { %v3480_v34 = vpop.f32.mrb[12].mxu1 }
 0x74f   : > { %v1675_v35 = vpop.f32.mrb[13].mxu1 }
 0x752   : > { %v1598_v30 = vpop.f32.mrb[10].mxu0  ;;  %v3483_v36 = vpop.f32.mrb[14].mxu1 }
 0x753   : > { %v4304_v31 = vpop.f32.mrb[11].mxu0  ;;  %v1685_v52 = vpop.f32.mrb[15].mxu1 }
 0x756   : > { %v1604_v33 = vpop.f32.mrb[16].mxu0  ;;  %v3486_v39 = vpop.f32.mrb[16].mxu1 }
 0x757   : > { %v1714_v32 = vpack.c.bf16 %v1604_v33, %v1598_v30  ;;  %v4306_v50 = vpop.f32.mrb[17].mxu0  ;;  %v1695_v54 = vpop.f32.mrb[17].mxu1 }
 0x759   : > { %1716 = vrot.lane.b32.xlu0 %v1714_v32, %s4661_s19  ;;  %3490 = vmatprep.subr.bf16.mxu0 %v1714_v32 }
 0x75a   : > { %3491 = vmatpush3.bf16.msra.mxu0 %v1714_v32  ;;  %v3489_v56 = vpop.f32.mrb[18].mxu1 }
 0x75b   : > { %v1705_v57 = vpop.f32.mrb[19].mxu1 }
 0x7cb   : > { %v1717_v53 = vpop.permute.xlu0 %1716 }
 0x7cc   : > { %3492 = vmatprep.subr.bf16.mxu0 %v1717_v53 }
 0x7cd   : > { %3493 = vmatpush3.bf16.msra.mxu0 %v1717_v53 }
 0x7d0   : > { %3495 = vmatmul.mubr.msk.bf16.vlgmr.msra.gmra.mrb[20].mxu0 %vm857_vm2, %v4142_v46 }
 0x7d1   : > { %3498 = vmatprep.mubr.msk.bf16.mxu0 %vm857_vm2, %v4145_v47 }
 0x7d8   : > { %3499 = vmatmul.mubr.msk.bf16.gmra.mrb[24].mxu0 %vm857_vm2, %v4152_v48 }
 0x7d9   : > { %2182 = vmatprep.mubr.f32.mxu0 %v3900_v18 }
 0x8a3   : > { %v3496_v60 = vpop.f32.mrb[20].mxu0 }
 0x8a4   : > { %v1762_v61 = vadd.f32 %v3496_v60, %v1685_v52  ;;  %v1753_v0 = vpop.f32.mrb[21].mxu0 }
 0x8a5   : > { %v1754_v46 = vadd.f32 %v1753_v0, %v1675_v35  ;;  %v3497_v28 = vpop.f32.mrb[22].mxu0 }
 0x8a6   : > { %v1792_v2 = vadd.f32 %v3296_v58, %v1762_v61  ;;  %v1765_v47 = vadd.f32 %v3497_v28, %v3483_v36  ;;  %v1756_v12 = vpop.f32.mrb[23].mxu0 }
 0x8a7   : > { %v1790_v3 = vadd.f32 %v3296_v58, %v1754_v46  ;;  %v1757_v48 = vadd.f32 %v3480_v34, %v1756_v12 }
 0x8a8   : > { %v1808_v8 = vmul.f32 0.2, %v1792_v2  ;;  %v1793_v16 = vadd.f32 %v3296_v58, %v1765_v47  ;;  %vm1800_vm5 = vcmp.gt.f32.partialorder %v1792_v2, 0.0 }
 0x8a9   : > { %v1806_v6 = vmul.f32 0.2, %v1790_v3  ;;  %v1791_v51 = vadd.f32 %v3296_v58, %v1757_v48  ;;  %vm1798_vm6 = vcmp.gt.f32.partialorder %v1790_v3, 0.0 }
 0x8aa   : > { %v1809_v59 = vmul.f32 0.2, %v1793_v16  ;;  %v4322_v7 = vsel %vm1800_vm5, %v1792_v2, %v1808_v8  ;;  %vm1801_vm7 = vcmp.gt.f32.partialorder %v1793_v16, 0.0  ;;  %v3298_v2 = vld [vmem:[%s4645_s10 + $0x1] ss:$0 sm:$0xff] }
 0x8ab   : > { %v1807_v9 = vmul.f32 0.2, %v1791_v51  ;;  %v3500_v10 = vpop.f32.mrb[24].mxu0  ;;  %v1830_v4 = vmul.f32 %v3297_v5, %v4322_v7  ;;  %vm1799_vm8 = vcmp.gt.f32.partialorder %v1791_v51, 0.0  ;;  %v4325_v49 = vsel %vm1798_vm6, %v1790_v3, %v1806_v6 }
 0x8ac   : > { %v1778_v55 = vadd.f32 %v3500_v10, %v1705_v57  ;;  %v1769_v21 = vpop.f32.mrb[25].mxu0  ;;  %v1828_v22 = vmul.f32 %v3297_v5, %v4325_v49  ;;  %v4331_v11 = vsel %vm1801_vm7, %v1793_v16, %v1809_v59 }
 0x8ad   : > { %v1770_v23 = vadd.f32 %v1769_v21, %v1695_v54  ;;  %v3501_v24 = vpop.f32.mrb[26].mxu0  ;;  %v1842_v25 = vsel %vm857_vm2, %v1830_v4, 0.0  ;;  %v4329_v37 = vsel %vm1799_vm8, %v1791_v51, %v1807_v9  ;;  %v1831_v41 = vmul.f32 %v3297_v5, %v4331_v11 }
 0x8ae   : > { %v1796_v14 = vadd.f32 %v3296_v58, %v1778_v55  ;;  %v1781_v17 = vadd.f32 %v3501_v24, %v3489_v56  ;;  %1843 = vadd.xlane.f32.xlu0 %v1842_v25  ;;  %v1772_v15 = vpop.f32.mrb[27].mxu0  ;;  %v1829_v19 = vmul.f32 %v3297_v5, %v4329_v37  ;;  %v1836_v45 = vsel %vm857_vm2, %v1828_v22, 0.0 }
 0x8af   : > { %v1794_v20 = vadd.f32 %v3296_v58, %v1770_v23  ;;  %v1773_v29 = vadd.f32 %v3486_v39, %v1772_v15  ;;  %v1845_v32 = vsel %vm857_vm2, %v1831_v41, 0.0 }
 0x8b0   : > { %v1797_v40 = vadd.f32 %v3296_v58, %v1781_v17  ;;  %v1839_v13 = vsel %vm857_vm2, %v1829_v19, 0.0  ;;  %v1812_v38 = vmul.f32 0.2, %v1796_v14  ;;  %vm1804_vm12 = vcmp.gt.f32.partialorder %v1796_v14, 0.0 }
 0x8b1   : > { %v1810_v43 = vmul.f32 0.2, %v1794_v20  ;;  %v1795_v44 = vadd.f32 %v3296_v58, %v1773_v29  ;;  %1840 = vadd.xlane.f32.xlu1 %v1839_v13  ;;  %vm1802_vm9 = vcmp.gt.f32.partialorder %v1794_v20, 0.0 }
 0x8b2   : > { %v1813_v42 = vmul.f32 0.2, %v1797_v40  ;;  %1837 = vadd.xlane.f32.xlu0 %v1836_v45  ;;  %vm1805_vm10 = vcmp.gt.f32.partialorder %v1797_v40, 0.0  ;;  %v4346_v53 = vsel %vm1804_vm12, %v1796_v14, %v1812_v38 }
 0x8b3   : > { %v1811_v30 = vmul.f32 0.2, %v1795_v44  ;;  %vm1803_vm11 = vcmp.gt.f32.partialorder %v1795_v44, 0.0  ;;  %v4337_v33 = vsel %vm1802_vm9, %v1794_v20, %v1810_v43  ;;  %v1834_v57 = vmul.f32 %v3297_v5, %v4346_v53 }
 0x8b4   : > { %v1832_v35 = vmul.f32 %v3297_v5, %v4337_v33  ;;  %v4343_v36 = vsel %vm1805_vm10, %v1797_v40, %v1813_v42 }
 0x8b5   : > { %v4340_v34 = vsel %vm1803_vm11, %v1795_v44, %v1811_v30  ;;  %v1835_v54 = vmul.f32 %v3297_v5, %v4343_v36  ;;  %v1854_v60 = vsel %vm857_vm2, %v1834_v57, 0.0 }
 0x8b6   : > { %1846 = vadd.xlane.f32.xlu0 %v1845_v32  ;;  %v1833_v52 = vmul.f32 %v3297_v5, %v4340_v34  ;;  %v1848_v56 = vsel %vm857_vm2, %v1832_v35, 0.0 }
 0x8b7   : > { %v1857_v58 = vsel %vm857_vm2, %v1835_v54, 0.0 }
 0x8b8   : > { %v1851_v39 = vsel %vm857_vm2, %v1833_v52, 0.0 }
 0x8b9   : > { %1852 = vadd.xlane.f32.xlu1 %v1851_v39 }
 0x8ba   : > { %1849 = vadd.xlane.f32.xlu0 %v1848_v56 }
 0x8bd   : > { %1858 = vadd.xlane.f32.xlu1 %v1857_v58 }
 0x8be   : > { %1855 = vadd.xlane.f32.xlu0 %v1854_v60 }
 0x93b   : > { %v1844_v61 = vpop.xlane.xlu0 %1843 }
 0x93c   : > { %v1868_v6 = vadd.f32 %v3298_v2, %v1844_v61 }
 0x93e   : > { %v1841_v46 = vpop.xlane.xlu1 %1840  ;;  %v1876_v17 = vsel %vm1263_vm13, %v1868_v6, -inf }
 0x93f   : > { %v1838_v0 = vpop.xlane.xlu0 %1837  ;;  %v1867_v48 = vadd.f32 %v3298_v2, %v1841_v46 }
 0x940   : > { %v1866_v8 = vadd.f32 %v3298_v2, %v1838_v0 }
 0x941   : > { %v1875_v55 = vsel %vm1263_vm13, %v1867_v48, -inf }
 0x942   : > { %v1874_v21 = vsel %vm1263_vm13, %v1866_v8, -inf }
 0x943   : > { %v1847_v28 = vpop.xlane.xlu0 %1846 }
 0x944   : > { %v1869_v5 = vadd.f32 %v3298_v2, %v1847_v28 }
 0x946   : > { %v1853_v47 = vpop.xlane.xlu1 %1852  ;;  %v1877_v23 = vsel %vm1263_vm13, %v1869_v5, -inf }
 0x947   : > { %v1871_v12 = vadd.f32 %v3298_v2, %v1853_v47  ;;  %v1850_v3 = vpop.xlane.xlu0 %1849 }
 0x948   : > { %v1870_v16 = vadd.f32 %v3298_v2, %v1850_v3 }
 0x949   : > { %v1880_v51 = vsel %vm1263_vm13, %v1871_v12, -inf }
 0x94a   : > { %v1878_v59 = vsel %vm1263_vm13, %v1870_v16, -inf  ;;  %v1859_v9 = vpop.xlane.xlu1 %1858  ;;  %v1881_v24 = vmax.f32 %v1875_v55, %v1880_v51 }
 0x94b   : > { %v1873_v10 = vadd.f32 %v3298_v2, %v1859_v9  ;;  %v1856_v4 = vpop.xlane.xlu0 %1855  ;;  %v1879_v25 = vmax.f32 %v1874_v21, %v1878_v59 }
 0x94c   : > { %v1872_v22 = vadd.f32 %v3298_v2, %v1856_v4 }
 0x94d   : > { %v1884_v14 = vsel %vm1263_vm13, %v1873_v10, -inf  ;;  %v1886_v29 = vmax.f32 %v1879_v25, %v1881_v24 }
 0x94e   : > { %v1885_v15 = vmax.f32 %v1877_v23, %v1884_v14  ;;  %v1882_v19 = vsel %vm1263_vm13, %v1872_v22, -inf }
 0x94f   : > { %v1883_v20 = vmax.f32 %v1876_v17, %v1882_v19 }
 0x951   : > { %v1887_v40 = vmax.f32 %v1883_v20, %v1885_v15 }
 0x953   : > { %v1888_v13 = vmax.f32 %v1886_v29, %v1887_v40 }
 0x955   : > { %v1889_v41 = vrot.slane %v1888_v13, 4 }
 0x957   : > { %v1890_v43 = vmax.f32 %v1888_v13, %v1889_v41 }
 0x959   : > { %v1891_v44 = vrot.slane %v1890_v43, 2 }
 0x95b   : > { %v1892_v45 = vmax.f32 %v1890_v43, %v1891_v44 }
 0x95d   : > { %v1893_v38 = vrot.slane %v1892_v45, 1 }
 0x95f   : > { %v1894_v42 = vmax.f32 %v1892_v45, %v1893_v38 }
 0x961   : > { %v1896_v30 = vsub.f32 %v1867_v48, %v1894_v42  ;;  %v1895_v32 = vsub.f32 %v1866_v8, %v1894_v42  ;;  %v1897_v35 = vsub.f32 %v1868_v6, %v1894_v42  ;;  %v1898_v56 = vsub.f32 %v1869_v5, %v1894_v42 }
 0x962   : > { %v1899_v58 = vsub.f32 %v1870_v16, %v1894_v42  ;;  %v1900_v61 = vsub.f32 %v1871_v12, %v1894_v42  ;;  %v1901_v28 = vsub.f32 %v1872_v22, %v1894_v42  ;;  %v1902_v48 = vsub.f32 %v1873_v10, %v1894_v42 }
 0x963   : > { %v1905_v52 = vmul.f32 1.442695, %v1896_v30  ;;  %v1903_v39 = vmul.f32 1.442695, %v1895_v32  ;;  %v1907_v54 = vmul.f32 1.442695, %v1897_v35 }
 0x964   : > { %v1909_v57 = vmul.f32 1.442695, %v1898_v56  ;;  %v1911_v60 = vmul.f32 1.442695, %v1899_v58  ;;  %v1913_v2 = vmul.f32 1.442695, %v1900_v61 }
 0x965   : > { %3838 = vpow2.f32 %v1905_v52  ;;  %v1915_v3 = vmul.f32 1.442695, %v1901_v28  ;;  %v1917_v16 = vmul.f32 1.442695, %v1902_v48 }
 0x966   : > { %3840 = vpow2.f32 %v1903_v39 }
 0x967   : > { %3842 = vpow2.f32 %v1907_v54 }
 0x968   : > { %3844 = vpow2.f32 %v1909_v57 }
 0x969   : > { %3846 = vpow2.f32 %v1911_v60 }
 0x96a   : > { %3848 = vpow2.f32 %v1913_v2 }
 0x96b   : > { %3850 = vpow2.f32 %v1915_v3 }
 0x96c   : > { %3852 = vpow2.f32 %v1917_v16 }
 0x96f   : > { %v3839_v0 = vpop.eup %3838 }
 0x970   : > { %v3841_v46 = vpop.eup %3840  ;;  %1926 = vperm.xlu1 %3684, %v3839_v0  }
 0x971   : > { %1921 = vperm.xlu0 %3727, %v3841_v46   ;;  %v3843_v47 = vpop.eup %3842  ;;  %v3728_v59 = vpack.i.bf16 %v3839_v0, %v3841_v46 }
 0x972   : > { %v3845_v8 = vpop.eup %3844 }
 0x973   : > { %v3847_v5 = vpop.eup %3846  ;;  %v3733_v9 = vpack.i.bf16 %v3845_v8, %v3843_v47 }
 0x974   : > { %1931 = vperm.xlu1 %3684, %v3843_v47   ;;  %v3849_v12 = vpop.eup %3848 }
 0x975   : > { %3768 = vset.pattern.permute.xlu0 %v3906_v63  ;;  %v3851_v6 = vpop.eup %3850  ;;  %v3738_v10 = vpack.i.bf16 %v3849_v12, %v3847_v5 }
 0x976   : > { %v3853_v51 = vpop.eup %3852 }
 0x977   : > { %v3763_v4 = vpack.i.bf16 %v3853_v51, %v3851_v6 }
 0x978   : > { %1936 = vperm.xlu1 %3684, %v3845_v8  }
 0x97c   : > { %1941 = vperm.xlu1 %3684, %v3847_v5  }
 0x980   : > { %1946 = vperm.xlu1 %3684, %v3849_v12  }
 0x984   : > { %1951 = vperm.xlu1 %3684, %v3851_v6  }
 0x988   : > { %1956 = vperm.xlu1 %3684, %v3853_v51  }
 0x98c   : > { %3729 = vrot.lane.b32.xlu1 %v3728_v59, %s4671_s2 }
 0x98d   : > { %3769 = vset.pattern.permute.xlu1 %v3906_v63 }
 0x990   : > { %3734 = vrot.lane.b32.xlu1 %v3733_v9, %s4671_s2 }
 0x994   : > { %3739 = vrot.lane.b32.xlu1 %v3738_v10, %s4671_s2 }
 0x998   : > { %3764 = vrot.lane.b32.xlu1 %v3763_v4, %s4671_s2 }
 0x9ef   : > { %v1927_v55 = vpop.permute.xlu1 %1926 }
 0x9f0   : > { %v1960_v21 = vmul.f32 %v1927_v55, %v4329_v37  ;;  %v1922_v22 = vpop.permute.xlu0 %1921  ;;  %v3878_v55 = vld [vmem:[%s4085_s30] sm:$0xff] }
 0x9f1   : > { %v1959_v23 = vmul.f32 %v1922_v22, %v4325_v49  ;;  %v724_v22 = vld [vmem:[%s4641_s6 + $0x98] sm:$0xff] }
 0x9f3   : > { %v3743_v24 = vpack.i.bf16 %v1960_v21, %v1959_v23  ;;  %v1932_v25 = vpop.permute.xlu1 %1931  ;;  %v722_v21 = vld [vmem:[%s4641_s6 + $0x88] sm:$0xff]  ;;  %v721_v23 = vld [vmem:[%s4641_s6 + $0x80] sm:$0xff] }
 0x9f4   : > { %v1961_v17 = vmul.f32 %v1932_v25, %v4322_v7  ;;  %v723_v25 = vld [vmem:[%s4641_s6 + $0x90] sm:$0xff] }
 0x9f5   : > { %3744 = vrot.lane.b32.xlu0 %v3743_v24, %s4672_s21  ;;  %v3625_v24 = vpack.c.bf16 %v724_v22, %v722_v21 }
 0x9f7   : > { %v1937_v14 = vpop.permute.xlu1 %1936  ;;  %3626 = vmatprep.subr.bf16.mxu0 %v3625_v24 }
 0x9f8   : > { %v1962_v15 = vmul.f32 %v1937_v14, %v4331_v11  ;;  %v3627_v14 = vpack.c.bf16 %v723_v25, %v721_v23  ;;  %v3315_v25 = vld [vmem:[%s4643_s8 + $0x2] ss:$0 sm:$0xff] }
 0x9fa   : > { %v3748_v19 = vpack.i.bf16 %v1962_v15, %v1961_v17  ;;  %3628 = vmatpush1.bf16.msra.mxu0 %v3627_v14 }
 0x9fb   : > { %v1942_v20 = vpop.permute.xlu1 %1941 }
 0x9fc   : > { %3749 = vrot.lane.b32.xlu0 %v3748_v19, %s4672_s21  ;;  %v1963_v40 = vmul.f32 %v1942_v20, %v4337_v33 }
 0x9ff   : > { %v1947_v29 = vpop.permute.xlu1 %1946 }
 0xa00   : > { %v1964_v37 = vmul.f32 %v1947_v29, %v4340_v34 }
 0xa02   : > { %v3753_v13 = vpack.i.bf16 %v1964_v37, %v1963_v40 }
 0xa03   : > { %v1952_v49 = vpop.permute.xlu1 %1951 }
 0xa04   : > { %3754 = vrot.lane.b32.xlu0 %v3753_v13, %s4672_s21  ;;  %v1965_v43 = vmul.f32 %v1952_v49, %v4346_v53  ;;  %v726_v49 = vld [vmem:[%s4641_s6 + $0xa8] sm:$0xff] }
 0xa07   : > { %v1957_v41 = vpop.permute.xlu1 %1956 }
 0xa08   : > { %v1966_v7 = vmul.f32 %v1957_v41, %v4343_v36  ;;  %v728_v41 = vld [vmem:[%s4641_s6 + $0xb8] sm:$0xff] }
 0xa0a   : > { %v3758_v44 = vpack.i.bf16 %v1966_v7, %v1965_v43  ;;  %v725_v43 = vld [vmem:[%s4641_s6 + $0xa0] sm:$0xff]  ;;  %v3629_v7 = vpack.c.bf16 %v728_v41, %v726_v49 }
 0xa0b   : > { %v3730_v11 = vpop.permute.xlu1 %3729 }
 0xa0c   : > { %3759 = vrot.lane.b32.xlu0 %v3758_v44, %s4672_s21  ;;  %v3732_v38 = vunpack.i.h.bf16 %v3730_v11  ;;  %v3731_v42 = vunpack.i.l.bf16 %v3730_v11  ;;  %v727_v44 = vld [vmem:[%s4641_s6 + $0xb0] sm:$0xff]  ;;  %3630 = vmatprep.subr.bf16.mxu0 %v3629_v7  ;;  %v3316_v7 = vld [vmem:[%s4644_s9 + $0x2] ss:$0 sm:$0xff] }
 0xa0d   : > { %v3631_v11 = vpack.c.bf16 %v727_v44, %v725_v43 }
 0xa0f   : > { %v3735_v52 = vpop.permute.xlu1 %3734  ;;  %3632 = vmatpush1.bf16.msra.mxu0 %v3631_v11 }
 0xa10   : > { %v3737_v36 = vunpack.i.h.bf16 %v3735_v52  ;;  %v3736_v53 = vunpack.i.l.bf16 %v3735_v52 }
 0xa13   : > { %v3740_v61 = vpop.permute.xlu1 %3739 }
 0xa14   : > { %v3742_v46 = vunpack.i.h.bf16 %v3740_v61  ;;  %v3741_v28 = vunpack.i.l.bf16 %v3740_v61  ;;  %v3881_v61 = vld [vmem:[%s4085_s30 + $0x10] sm:$0xff] }
 0xa17   : > { %v3765_v16 = vpop.permute.xlu1 %3764 }
 0xa18   : > { %v3767_v12 = vunpack.i.h.bf16 %v3765_v16  ;;  %v3766_v6 = vunpack.i.l.bf16 %v3765_v16 }
 0xa67   : > { %v3745_v45 = vpop.permute.xlu0 %3744 }
 0xa68   : > { %v3747_v30 = vunpack.i.h.bf16 %v3745_v45  ;;  %v3746_v33 = vunpack.i.l.bf16 %v3745_v45 }
 0xa6a   : > { %v2024_v34 = vsel %vm857_vm2, %v3747_v30, %v3732_v38  ;;  %v2023_v32 = vsel %vm857_vm2, %v3746_v33, %v3731_v42  ;;  %v3300_v38 = vld [vmem:[%s4646_s11 + $0x1] ss:$0 sm:$0xff] }
 0xa6b   : > { %v2031_v35 = vpack.c.bf16 %v2024_v34, %v2023_v32 }
 0xa6d   : > { %3503 = vmatpush3.bf16.msra.mxu1 %v2031_v35 }
 0xa6e   : > { %v3750_v39 = vpop.permute.xlu0 %3749  ;;  %3504 = vmatprep.subr.bf16.mxu1 %v3900_v18 }
 0xa6f   : > { %v3752_v54 = vunpack.i.h.bf16 %v3750_v39  ;;  %v3751_v56 = vunpack.i.l.bf16 %v3750_v39 }
 0xa71   : > { %v2026_v57 = vsel %vm857_vm2, %v3752_v54, %v3737_v36  ;;  %v2025_v58 = vsel %vm857_vm2, %v3751_v56, %v3736_v53 }
 0xa72   : > { %v2032_v60 = vpack.c.bf16 %v2026_v57, %v2025_v58  ;;  %v3879_v57 = vld [vmem:[%s4102_s25] sm:$0xff]   ;;  %v731_v58 = vld [vmem:[%s4642_s7 + $0x10] sm:$0xff] }
 0xa74   : > { %3505 = vmatpush3.bf16.msra.mxu1 %v2032_v60  ;;  %v3880_v60 = vld [vmem:[%s4085_s30 + $0x8] sm:$0xff] }
 0xa75   : > { %3506 = vmatprep.subr.bf16.mxu1 %v3900_v18 }
 0xa76   : > { %v3755_v0 = vpop.permute.xlu0 %3754 }
 0xa77   : > { %v3757_v2 = vunpack.i.h.bf16 %v3755_v0  ;;  %v3756_v47 = vunpack.i.l.bf16 %v3755_v0  ;;  %v3882_v0 = vld [vmem:[%s4085_s30 + $0x18] sm:$0xff] }
 0xa79   : > { %v2028_v3 = vsel %vm857_vm2, %v3757_v2, %v3742_v46  ;;  %v2027_v48 = vsel %vm857_vm2, %v3756_v47, %v3741_v28  ;;  %v3883_v46 = vld [vmem:[%s4085_s30 + $0x20] sm:$0xff]  ;;  %v3884_v28 = vld [vmem:[%s4085_s30 + $0x28] sm:$0xff]  ;;  %v3885_v2 = vld [vmem:[%s4085_s30 + $0x30] sm:$0xff] }
 0xa7a   : > { %v2033_v8 = vpack.c.bf16 %v2028_v3, %v2027_v48  ;;  %v3886_v47 = vld [vmem:[%s4085_s30 + $0x38] sm:$0xff] }
 0xa7c   : > { %3507 = vmatpush3.bf16.msra.mxu1 %v2033_v8 }
 0xa7d   : > { %3508 = vmatprep.subr.bf16.mxu1 %v3900_v18 }
 0xa7e   : > { %v3760_v5 = vpop.permute.xlu0 %3759 }
 0xa7f   : > { %v3762_v51 = vunpack.i.h.bf16 %v3760_v5  ;;  %v3761_v59 = vunpack.i.l.bf16 %v3760_v5 }
 0xa81   : > { %v2030_v9 = vsel %vm857_vm2, %v3762_v51, %v3767_v12  ;;  %v2029_v10 = vsel %vm857_vm2, %v3761_v59, %v3766_v6 }
 0xa82   : > { %v2034_v4 = vpack.c.bf16 %v2030_v9, %v2029_v10  ;;  %v3887_v10 = vld [vmem:[%s4102_s25 + $0x8] sm:$0xff]  }
 0xa84   : > { %3509 = vmatpush3.bf16.msra.mxu1 %v2034_v4  ;;  %v3888_v4 = vld [vmem:[%s4102_s25 + $0x10] sm:$0xff]  }
 0xa85   : > { %3514 = vmatprep.subr.mxu1 %v731_v58 }
 0xa87   : > { %3511 = vmatmul.mubr.msk.bf16.vlgmr.msra.gmra.mrb[20].mxu1 %vm1445_vm15, %v4241_v62 }
 0xa88   : > { %3516 = vmatprep.mubr.msk.f32.mxu1 %vm941_vm4, %v3878_v55  ;;  %3515 = vmatpush3.msra.mxu1 %v731_v58  ;;  %v3889_v55 = vld [vmem:[%s4102_s25 + $0x18] sm:$0xff]  }
 0xa89   : > { %3540 = vmatprep.subr.bf16.mxu1 %v3900_v18 }
 0xa8f   : > { %3517 = vmatmul.mubr.msk.f32.vlgmr.msra.gmra.mrb[24].mxu1 %vm941_vm4, %v3880_v60 }
 0xa90   : > { %3519 = vmatprep.mubr.msk.f32.mxu1 %vm941_vm4, %v3881_v61 }
 0xa93   : > { %3520 = vmatmul.mubr.msk.f32.gmra.mrb[26].mxu1 %vm941_vm4, %v3882_v0 }
 0xa94   : > { %3522 = vmatprep.mubr.msk.f32.mxu1 %vm941_vm4, %v3883_v46 }
 0xa97   : > { %3523 = vmatmul.mubr.msk.f32.gmra.mrb[28].mxu1 %vm941_vm4, %v3884_v28 }
 0xa98   : > { %3525 = vmatprep.mubr.msk.f32.mxu1 %vm941_vm4, %v3885_v2 }
 0xa9b   : > { %3526 = vmatmul.mubr.msk.f32.gmra.mrb[30].mxu1 %vm941_vm4, %v3886_v47 }
 0xa9c   : > { %3548 = vmatprep.mubr.msk.bf16.mxu1 %vm3905_vm14, %v3900_v18 }
 0xb5a   : > { %v2069_v17 = vpop.f32.mrb[20].mxu1 }
 0xb5b   : > { %v2076_v15 = vmax.f32 %v2069_v17, 1e-30  ;;  %v3512_v19 = vpop.f32.mrb[21].mxu1 }
 0xb5c   : > { %v2072_v20 = vpop.f32.mrb[22].mxu1 }
 0xb5d   : > { %3854 = vrcp.f32 %v2076_v15  ;;  %v2077_v29 = vmax.f32 %v2072_v20, 1e-30  ;;  %v3513_v40 = vpop.f32.mrb[23].mxu1 }
 0xb5f   : > { %3856 = vrcp.f32 %v2077_v29 }
 0xb62   : > { %v3518_v12 = vpop.f32.mrb[24].mxu1 }
 0xb63   : > { %v2261_v6 = vpop.f32.mrb[25].mxu1 }
 0xb66   : > { %v3521_v51 = vpop.f32.mrb[26].mxu1 }
 0xb67   : > { %v3855_v37 = vpop.eup %3854  ;;  %v2271_v59 = vpop.f32.mrb[27].mxu1 }
 0xb68   : > { %2082 = vperm.xlu0 %3768, %v3855_v37  }
 0xb69   : > { %v3857_v13 = vpop.eup %3856 }
 0xb6a   : > { %2087 = vperm.xlu1 %3769, %v3857_v13   ;;  %v3524_v21 = vpop.f32.mrb[28].mxu1 }
 0xb6b   : > { %v2281_v22 = vpop.f32.mrb[29].mxu1 }
 0xb6c   : > { %3771 = vset.pattern.permute.xlu0 %v3902_v1 }
 0xb6e   : > { %3770 = vset.pattern.permute.xlu1 %v3902_v1  ;;  %v3527_v23 = vpop.f32.mrb[30].mxu1 }
 0xb6f   : > { %v2291_v24 = vpop.f32.mrb[31].mxu1 }
 0xbe7   : > { %v2083_v1 = vpop.permute.xlu0 %2082 }
 0xbe8   : > { %v2090_v45 = vmul.f32 %v2083_v1, %v2069_v17 }
 0xbe9   : > { %v2088_v42 = vpop.permute.xlu1 %2087 }
 0xbea   : > { %v2092_v30 = vadd.f32 %v2090_v45, %v4304_v31  ;;  %v2091_v33 = vmul.f32 %v2088_v42, %v2072_v20 }
 0xbec   : > { %v2100_v34 = vadd.f32 %v3300_v38, %v2092_v30  ;;  %v2093_v32 = vadd.f32 %v2091_v33, %v4306_v50 }
 0xbee   : > { %vm2102_vm1 = vcmp.gt.f32.partialorder %v2100_v34, 0.0  ;;  %v2104_v35 = vmul.f32 0.2, %v2100_v34  ;;  %v2101_v52 = vadd.f32 %v3300_v38, %v2093_v32 }
 0xbf0   : > { %v2106_v39 = vsel %vm2102_vm1, %v2100_v34, %v2104_v35  ;;  %vm2103_vm3 = vcmp.gt.f32.partialorder %v2101_v52, 0.0  ;;  %v2105_v36 = vmul.f32 0.2, %v2101_v52 }
 0xbf1   : > { %v2108_v53 = vadd.f32 %v2106_v39, %v4069_v26 }
 0xbf2   : > { %v2107_v54 = vsel %vm2103_vm3, %v2101_v52, %v2105_v36 }
 0xbf3   : > { %v2110_v56 = vmax.f32 %v2108_v53, 0.0  ;;  %v2109_v31 = vadd.f32 %v2107_v54, %v4074_v27 }
 0xbf5   : > { %3301 = vmatmul.mubr.msk.f32.vlgmr.msra.gmra.mrb[18].mxu0 %vm857_vm2, %v2110_v56  ;;  %v2111_v50 = vmax.f32 %v2109_v31, 0.0 }
 0xbf6   : > { %2188 = vmatprep.mubr.f32.mxu0 %v3900_v18 }
 0xbf9   : > { %3302 = vmatmul.mubr.msk.f32.gmra.mrb[28].mxu0 %vm857_vm2, %v2111_v50 }
 0xbfa   : > { %3532 = vmatprep.mubr.msk.bf16.mxu0 %vm857_vm2, %v3879_v57 }
 0xcc8   : > { %v2184_v3 = vpop.f32.mrb[18].mxu0 }
 0xcc9   : > { %v4456_v48 = vpop.f32.mrb[19].mxu0 }
 0xccc   : > { %v2190_v8 = vpop.f32.mrb[28].mxu0 }
 0xccd   : > { %v2300_v16 = vpack.c.bf16 %v2190_v8, %v2184_v3  ;;  %v4458_v5 = vpop.f32.mrb[29].mxu0 }
 0xccf   : > { %2302 = vrot.lane.b32.xlu1 %v2300_v16, %s4673_s4  ;;  %3528 = vmatprep.subr.bf16.mxu0 %v2300_v16 }
 0xcd0   : > { %3529 = vmatpush3.bf16.msra.mxu0 %v2300_v16 }
 0xd41   : > { %v2303_v9 = vpop.permute.xlu1 %2302 }
 0xd42   : > { %3530 = vmatprep.subr.bf16.mxu0 %v2303_v9 }
 0xd43   : > { %3531 = vmatpush3.bf16.msra.mxu0 %v2303_v9 }
 0xd46   : > { %3533 = vmatmul.mubr.msk.bf16.vlgmr.msra.gmra.mrb[32].mxu0 %vm857_vm2, %v3887_v10 }
 0xd47   : > { %3536 = vmatprep.mubr.msk.bf16.mxu0 %vm857_vm2, %v3888_v4 }
 0xd4e   : > { %3537 = vmatmul.mubr.msk.bf16.gmra.mrb[36].mxu0 %vm857_vm2, %v3889_v55 }
 0xe19   : > { %v3534_v14 = vpop.f32.mrb[32].mxu0 }
 0xe1a   : > { %v2348_v17 = vadd.f32 %v3534_v14, %v2271_v59  ;;  %v2339_v15 = vpop.f32.mrb[33].mxu0 }
 0xe1b   : > { %v2340_v19 = vadd.f32 %v2339_v15, %v2261_v6  ;;  %v3535_v20 = vpop.f32.mrb[34].mxu0 }
 0xe1c   : > { %v2378_v29 = vadd.f32 %v3315_v25, %v2348_v17  ;;  %v2351_v40 = vadd.f32 %v3535_v20, %v3521_v51  ;;  %v2342_v37 = vpop.f32.mrb[35].mxu0 }
 0xe1d   : > { %v2376_v13 = vadd.f32 %v3315_v25, %v2340_v19  ;;  %v2343_v49 = vadd.f32 %v3518_v12, %v2342_v37 }
 0xe1e   : > { %v2394_v41 = vmul.f32 0.2, %v2378_v29  ;;  %v2379_v43 = vadd.f32 %v3315_v25, %v2351_v40  ;;  %vm2386_vm4 = vcmp.gt.f32.partialorder %v2378_v29, 0.0 }
 0xe1f   : > { %v2392_v44 = vmul.f32 0.2, %v2376_v13  ;;  %v2377_v11 = vadd.f32 %v3315_v25, %v2343_v49  ;;  %vm2384_vm5 = vcmp.gt.f32.partialorder %v2376_v13, 0.0 }
 0xe20   : > { %v2395_v1 = vmul.f32 0.2, %v2379_v43  ;;  %v4473_v45 = vsel %vm2386_vm4, %v2378_v29, %v2394_v41  ;;  %vm2387_vm6 = vcmp.gt.f32.partialorder %v2379_v43, 0.0  ;;  %v3317_v29 = vld [vmem:[%s4645_s10 + $0x2] ss:$0 sm:$0xff] }
 0xe21   : > { %v2393_v38 = vmul.f32 0.2, %v2377_v11  ;;  %v3538_v42 = vpop.f32.mrb[36].mxu0  ;;  %v2416_v30 = vmul.f32 %v3316_v7, %v4473_v45  ;;  %vm2385_vm7 = vcmp.gt.f32.partialorder %v2377_v11, 0.0  ;;  %v4476_v33 = vsel %vm2384_vm5, %v2376_v13, %v2392_v44 }
 0xe22   : > { %v2364_v34 = vadd.f32 %v3538_v42, %v2291_v24  ;;  %v2355_v32 = vpop.f32.mrb[37].mxu0  ;;  %v4478_v35 = vsel %vm2387_vm6, %v2379_v43, %v2395_v1  ;;  %v2414_v54 = vmul.f32 %v3316_v7, %v4476_v33 }
 0xe23   : > { %v2356_v52 = vadd.f32 %v2355_v32, %v2281_v22  ;;  %v3539_v39 = vpop.f32.mrb[38].mxu0  ;;  %v2428_v36 = vsel %vm857_vm2, %v2416_v30, 0.0  ;;  %v4481_v53 = vsel %vm2385_vm7, %v2377_v11, %v2393_v38  ;;  %v2417_v61 = vmul.f32 %v3316_v7, %v4478_v35 }
 0xe24   : > { %v2382_v56 = vadd.f32 %v3315_v25, %v2364_v34  ;;  %v2367_v31 = vadd.f32 %v3539_v39, %v3527_v23  ;;  %v2358_v50 = vpop.f32.mrb[39].mxu0  ;;  %2429 = vadd.xlane.f32.xlu0 %v2428_v36  ;;  %v2415_v57 = vmul.f32 %v3316_v7, %v4481_v53  ;;  %v2422_v3 = vsel %vm857_vm2, %v2414_v54, 0.0 }
 0xe25   : > { %v2380_v58 = vadd.f32 %v3315_v25, %v2356_v52  ;;  %v2359_v60 = vadd.f32 %v3524_v21, %v2358_v50  ;;  %v2431_v59 = vsel %vm857_vm2, %v2417_v61, 0.0 }
 0xe26   : > { %v2398_v0 = vmul.f32 0.2, %v2382_v56  ;;  %v2383_v46 = vadd.f32 %v3315_v25, %v2367_v31  ;;  %v2425_v28 = vsel %vm857_vm2, %v2415_v57, 0.0  ;;  %vm2390_vm8 = vcmp.gt.f32.partialorder %v2382_v56, 0.0 }
 0xe27   : > { %v2396_v2 = vmul.f32 0.2, %v2380_v58  ;;  %v2381_v47 = vadd.f32 %v3315_v25, %v2359_v60  ;;  %2426 = vadd.xlane.f32.xlu1 %v2425_v28  ;;  %vm2388_vm9 = vcmp.gt.f32.partialorder %v2380_v58, 0.0 }
 0xe28   : > { %v2399_v8 = vmul.f32 0.2, %v2383_v46  ;;  %2423 = vadd.xlane.f32.xlu0 %v2422_v3  ;;  %v4488_v16 = vsel %vm2390_vm8, %v2382_v56, %v2398_v0  ;;  %vm2391_vm11 = vcmp.gt.f32.partialorder %v2383_v46, 0.0 }
 0xe29   : > { %v2397_v12 = vmul.f32 0.2, %v2381_v47  ;;  %v4490_v6 = vsel %vm2388_vm9, %v2380_v58, %v2396_v2  ;;  %vm2389_vm10 = vcmp.gt.f32.partialorder %v2381_v47, 0.0  ;;  %v2420_v55 = vmul.f32 %v3316_v7, %v4488_v16 }
 0xe2a   : > { %v2418_v51 = vmul.f32 %v3316_v7, %v4490_v6  ;;  %v4499_v21 = vsel %vm2391_vm11, %v2383_v46, %v2399_v8 }
 0xe2b   : > { %v4494_v9 = vsel %vm2389_vm10, %v2381_v47, %v2397_v12  ;;  %v2421_v23 = vmul.f32 %v3316_v7, %v4499_v21  ;;  %v2440_v24 = vsel %vm857_vm2, %v2420_v55, 0.0 }
 0xe2c   : > { %2432 = vadd.xlane.f32.xlu0 %v2431_v59  ;;  %v2434_v10 = vsel %vm857_vm2, %v2418_v51, 0.0  ;;  %v2419_v4 = vmul.f32 %v3316_v7, %v4494_v9 }
 0xe2d   : > { %2435 = vadd.xlane.f32.xlu1 %v2434_v10  ;;  %v2443_v25 = vsel %vm857_vm2, %v2421_v23, 0.0 }
 0xe2e   : > { %v2437_v22 = vsel %vm857_vm2, %v2419_v4, 0.0 }
 0xe30   : > { %2438 = vadd.xlane.f32.xlu0 %v2437_v22 }
 0xe31   : > { %2441 = vadd.xlane.f32.xlu1 %v2440_v24 }
 0xe34   : > { %2444 = vadd.xlane.f32.xlu0 %v2443_v25 }
 0xeb1   : > { %v2430_v14 = vpop.xlane.xlu0 %2429 }
 0xeb2   : > { %v2454_v7 = vadd.f32 %v3317_v29, %v2430_v14 }
 0xeb4   : > { %v2427_v15 = vpop.xlane.xlu1 %2426  ;;  %v2462_v39 = vsel %vm1263_vm13, %v2454_v7, -inf }
 0xeb5   : > { %v2424_v17 = vpop.xlane.xlu0 %2423  ;;  %v2453_v37 = vadd.f32 %v3317_v29, %v2427_v15 }
 0xeb6   : > { %v2452_v44 = vadd.f32 %v3317_v29, %v2424_v17 }
 0xeb7   : > { %v2461_v42 = vsel %vm1263_vm13, %v2453_v37, -inf }
 0xeb8   : > { %v2460_v36 = vsel %vm1263_vm13, %v2452_v44, -inf }
 0xeb9   : > { %v2433_v19 = vpop.xlane.xlu0 %2432 }
 0xeba   : > { %v2436_v20 = vpop.xlane.xlu1 %2435  ;;  %v2455_v11 = vadd.f32 %v3317_v29, %v2433_v19 }
 0xebb   : > { %v2456_v13 = vadd.f32 %v3317_v29, %v2436_v20 }
 0xebc   : > { %v2463_v54 = vsel %vm1263_vm13, %v2455_v11, -inf }
 0xebd   : > { %v2439_v40 = vpop.xlane.xlu0 %2438  ;;  %v2464_v30 = vsel %vm1263_vm13, %v2456_v13, -inf }
 0xebe   : > { %v2457_v49 = vadd.f32 %v3317_v29, %v2439_v40  ;;  %v2442_v41 = vpop.xlane.xlu1 %2441  ;;  %v2465_v31 = vmax.f32 %v2460_v36, %v2464_v30 }
 0xebf   : > { %v2458_v43 = vadd.f32 %v3317_v29, %v2442_v41 }
 0xec0   : > { %v2466_v1 = vsel %vm1263_vm13, %v2457_v49, -inf }
 0xec1   : > { %v2445_v38 = vpop.xlane.xlu0 %2444  ;;  %v2468_v34 = vsel %vm1263_vm13, %v2458_v43, -inf  ;;  %v2467_v52 = vmax.f32 %v2461_v42, %v2466_v1 }
 0xec2   : > { %v2459_v32 = vadd.f32 %v3317_v29, %v2445_v38  ;;  %v2469_v50 = vmax.f32 %v2462_v39, %v2468_v34 }
 0xec3   : > { %v2472_v58 = vmax.f32 %v2465_v31, %v2467_v52 }
 0xec4   : > { %v2470_v56 = vsel %vm1263_vm13, %v2459_v32, -inf }
 0xec5   : > { %v2471_v57 = vmax.f32 %v2463_v54, %v2470_v56 }
 0xec7   : > { %v2473_v60 = vmax.f32 %v2469_v50, %v2471_v57 }
 0xec9   : > { %v2474_v61 = vmax.f32 %v2472_v58, %v2473_v60 }
 0xecb   : > { %v2475_v0 = vrot.slane %v2474_v61, 4 }
 0xecd   : > { %v2476_v46 = vmax.f32 %v2474_v61, %v2475_v0 }
 0xecf   : > { %v2477_v28 = vrot.slane %v2476_v46, 2 }
 0xed1   : > { %v2478_v2 = vmax.f32 %v2476_v46, %v2477_v28 }
 0xed3   : > { %v2479_v47 = vrot.slane %v2478_v2, 1 }
 0xed5   : > { %v2480_v3 = vmax.f32 %v2478_v2, %v2479_v47 }
 0xed7   : > { %v2488_v8 = vsub.f32 %v2459_v32, %v2480_v3  ;;  %v2482_v12 = vsub.f32 %v2453_v37, %v2480_v3  ;;  %v2481_v51 = vsub.f32 %v2452_v44, %v2480_v3  ;;  %v2483_v59 = vsub.f32 %v2454_v7, %v2480_v3 }
 0xed8   : > { %v2484_v10 = vsub.f32 %v2455_v11, %v2480_v3  ;;  %v2485_v4 = vsub.f32 %v2456_v13, %v2480_v3  ;;  %v2486_v24 = vsub.f32 %v2457_v49, %v2480_v3  ;;  %v2487_v14 = vsub.f32 %v2458_v43, %v2480_v3 }
 0xed9   : > { %v2503_v55 = vmul.f32 1.442695, %v2488_v8  ;;  %v2491_v22 = vmul.f32 1.442695, %v2482_v12  ;;  %v2489_v23 = vmul.f32 1.442695, %v2481_v51 }
 0xeda   : > { %v2493_v25 = vmul.f32 1.442695, %v2483_v59  ;;  %v2495_v17 = vmul.f32 1.442695, %v2484_v10  ;;  %v2497_v15 = vmul.f32 1.442695, %v2485_v4 }
 0xedb   : > { %3858 = vpow2.f32 %v2503_v55  ;;  %v2499_v19 = vmul.f32 1.442695, %v2486_v24  ;;  %v2501_v20 = vmul.f32 1.442695, %v2487_v14 }
 0xedc   : > { %3860 = vpow2.f32 %v2491_v22 }
 0xedd   : > { %3862 = vpow2.f32 %v2489_v23 }
 0xede   : > { %3864 = vpow2.f32 %v2493_v25 }
 0xedf   : > { %3866 = vpow2.f32 %v2495_v17 }
 0xee0   : > { %3868 = vpow2.f32 %v2497_v15 }
 0xee1   : > { %3870 = vpow2.f32 %v2499_v19 }
 0xee2   : > { %3872 = vpow2.f32 %v2501_v20 }
 0xee5   : > { %v3859_v29 = vpop.eup %3858 }
 0xee6   : > { %v3861_v40 = vpop.eup %3860 }
 0xee7   : > { %v3863_v37 = vpop.eup %3862  ;;  %2512 = vperm.xlu0 %3771, %v3861_v40  }
 0xee8   : > { %v3865_v13 = vpop.eup %3864  ;;  %2507 = vperm.xlu1 %3770, %v3863_v37   ;;  %v3772_v38 = vpack.i.bf16 %v3861_v40, %v3863_v37 }
 0xee9   : > { %v3867_v49 = vpop.eup %3866 }
 0xeea   : > { %v3869_v41 = vpop.eup %3868  ;;  %v3782_v43 = vpack.i.bf16 %v3867_v49, %v3865_v13 }
 0xeeb   : > { %v3871_v7 = vpop.eup %3870  ;;  %3812 = vset.pattern.permute.xlu0 %v3906_v63 }
 0xeec   : > { %v3873_v44 = vpop.eup %3872  ;;  %2517 = vperm.xlu1 %3770, %v3865_v13   ;;  %v3787_v11 = vpack.i.bf16 %v3871_v7, %v3869_v41 }
 0xeed   : > { %v3807_v1 = vpack.i.bf16 %v3859_v29, %v3873_v44 }
 0xef0   : > { %2522 = vperm.xlu1 %3770, %v3867_v49  }
 0xef4   : > { %2527 = vperm.xlu1 %3770, %v3869_v41  }
 0xef8   : > { %2532 = vperm.xlu1 %3770, %v3871_v7  }
 0xefc   : > { %2537 = vperm.xlu1 %3770, %v3873_v44  }
 0xf00   : > { %2542 = vperm.xlu1 %3770, %v3859_v29  }
 0xf04   : > { %3773 = vrot.lane.b32.xlu1 %v3772_v38, %s4671_s2  ;;  %v746_v38 = vld [vmem:[%s4648_s13] sm:$0xff] }
 0xf05   : > { %3813 = vset.pattern.permute.xlu1 %v3906_v63 }
 0xf66   : > { %v2513_v42 = vpop.permute.xlu0 %2512 }
 0xf67   : > { %v2546_v30 = vmul.f32 %v2513_v42, %v4481_v53  ;;  %v2508_v34 = vpop.permute.xlu1 %2507  ;;  %v747_v42 = vld [vmem:[%s4648_s13 + $0x8] sm:$0xff] }
 0xf68   : > { %v2545_v32 = vmul.f32 %v2508_v34, %v4476_v33 }
 0xf6a   : > { %v3777_v52 = vpack.i.bf16 %v2546_v30, %v2545_v32  ;;  %v3633_v30 = vpack.c.bf16 %v747_v42, %v746_v38  ;;  %v3330_v38 = vld [vmem:[#allocation2] ss:$0 sm:$0xff] }
 0xf6b   : > { %v2518_v39 = vpop.permute.xlu1 %2517 }
 0xf6c   : > { %3778 = vrot.lane.b32.xlu1 %v3777_v52, %s4672_s21  ;;  %v2547_v54 = vmul.f32 %v2518_v39, %v4473_v45  ;;  %3634 = vmatprep.subr.bf16.mxu0 %v3633_v30 }
 0xf6d   : > { %3636 = vmatpush3.bf16.msra.mxu0 %v3633_v30 }
 0xf6f   : > { %v2523_v36 = vpop.permute.xlu1 %2522 }
 0xf70   : > { %v2548_v56 = vmul.f32 %v2523_v36, %v4478_v35  ;;  %3783 = vrot.lane.b32.xlu1 %v3782_v43, %s4671_s2 }
 0xf72   : > { %v3792_v31 = vpack.i.bf16 %v2548_v56, %v2547_v54 }
 0xf73   : > { %v2528_v50 = vpop.permute.xlu1 %2527 }
 0xf74   : > { %3788 = vrot.lane.b32.xlu1 %v3787_v11, %s4671_s2  ;;  %3793 = vrot.lane.b32.xlu0 %v3792_v31, %s4672_s21  ;;  %v2549_v33 = vmul.f32 %v2528_v50, %v4490_v6  ;;  %v748_v31 = vld [vmem:[%s4648_s13 + $0x10] sm:$0xff]  ;;  %v749_v50 = vld [vmem:[%s4648_s13 + $0x18] sm:$0xff] }
 0xf77   : > { %v2533_v63 = vpop.permute.xlu1 %2532 }
 0xf78   : > { %v2550_v53 = vmul.f32 %v2533_v63, %v4494_v9  ;;  %3808 = vrot.lane.b32.xlu1 %v3807_v1, %s4671_s2  ;;  %v3890_v1 = vld [vmem:[%s4041_s22] sm:$0xff]  ;;  %v3637_v63 = vpack.c.bf16 %v749_v50, %v748_v31 }
 0xf7a   : > { %v3797_v57 = vpack.i.bf16 %v2550_v53, %v2549_v33  ;;  %v744_v33 = vld [vmem:[%s4647_s12] sm:$0xff]  ;;  %v745_v53 = vld [vmem:[%s4647_s12 + $0x8] sm:$0xff]  ;;  %3638 = vmatprep.subr.bf16.mxu0 %v3637_v63 }
 0xf7b   : > { %v2538_v58 = vpop.permute.xlu1 %2537  ;;  %3640 = vmatpush3.bf16.msra.mxu0 %v3637_v63 }
 0xf7c   : > { %3798 = vrot.lane.b32.xlu0 %v3797_v57, %s4672_s21  ;;  %v2551_v35 = vmul.f32 %v2538_v58, %v4488_v16  ;;  %v3641_v57 = vpack.c.bf16 %v745_v53, %v744_v33  ;;  %v755_v58 = vld [vmem:[%s4651_s16] sm:$0xff] }
 0xf7e   : > { %3642 = vmatprep.subr.bf16.mxu0 %v3641_v57 }
 0xf7f   : > { %v2543_v45 = vpop.permute.xlu1 %2542 }
 0xf80   : > { %v2552_v60 = vmul.f32 %v2543_v45, %v4499_v21  ;;  %v756_v45 = vld [vmem:[%s4651_s16 + $0x8] sm:$0xff] }
 0xf82   : > { %v3802_v61 = vpack.i.bf16 %v2552_v60, %v2551_v35  ;;  %v3645_v35 = vpack.c.bf16 %v756_v45, %v755_v58  ;;  %v3891_v60 = vld [vmem:[%s4041_s22 + $0x8] sm:$0xff]  ;;  %s681_s22 = scalar_lea.vmem %s4655_s20, %s4676_s24 }
 0xf83   : > { %v3774_v0 = vpop.permute.xlu1 %3773 }
 0xf84   : > { %3803 = vrot.lane.b32.xlu0 %v3802_v61, %s4672_s21  ;;  %v3776_v28 = vunpack.i.h.bf16 %v3774_v0  ;;  %v3775_v6 = vunpack.i.l.bf16 %v3774_v0 }
 0xfde   : > { %v3779_v46 = vpop.permute.xlu1 %3778 }
 0xfdf   : > { %v3781_v2 = vunpack.i.h.bf16 %v3779_v46  ;;  %v3780_v9 = vunpack.i.l.bf16 %v3779_v46  ;;  %v3319_v46 = vld [vmem:[%s4646_s11 + $0x2] ss:$0 sm:$0xff] }
 0xfe1   : > { %v2609_v47 = vsel %vm857_vm2, %v3780_v9, %v3775_v6  ;;  %v2610_v3 = vsel %vm857_vm2, %v3781_v2, %v3776_v28 }
 0xfe2   : > { %v2617_v8 = vpack.c.bf16 %v2610_v3, %v2609_v47  ;;  %v3784_v12 = vpop.permute.xlu1 %3783 }
 0xfe3   : > { %v3786_v21 = vunpack.i.h.bf16 %v3784_v12  ;;  %v3785_v51 = vunpack.i.l.bf16 %v3784_v12 }
 0xfe4   : > { %3541 = vmatpush3.bf16.msra.mxu1 %v2617_v8 }
 0xfe5   : > { %3542 = vmatprep.subr.bf16.mxu1 %v3900_v18 }
 0xfe6   : > { %v3794_v16 = vpop.permute.xlu0 %3793  ;;  %v3789_v23 = vpop.permute.xlu1 %3788 }
 0xfe7   : > { %v3796_v59 = vunpack.i.h.bf16 %v3794_v16  ;;  %v3795_v10 = vunpack.i.l.bf16 %v3794_v16  ;;  %v3791_v25 = vunpack.i.h.bf16 %v3789_v23  ;;  %v3790_v14 = vunpack.i.l.bf16 %v3789_v23  ;;  %v758_v23 = vld [vmem:[%s4653_s18] sm:$0xff] }
 0xfe9   : > { %v2611_v4 = vsel %vm857_vm2, %v3795_v10, %v3785_v51  ;;  %v2612_v55 = vsel %vm857_vm2, %v3796_v59, %v3786_v21 }
 0xfea   : > { %v2618_v22 = vpack.c.bf16 %v2612_v55, %v2611_v4  ;;  %v3809_v40 = vpop.permute.xlu1 %3808  ;;  %v754_v55 = vld [vmem:[%s4650_s15 + $0x18] sm:$0xff] }
 0xfeb   : > { %v3811_v13 = vunpack.i.h.bf16 %v3809_v40  ;;  %v3810_v49 = vunpack.i.l.bf16 %v3809_v40 }
 0xfec   : > { %3543 = vmatpush3.bf16.msra.mxu1 %v2618_v22 }
 0xfed   : > { %3544 = vmatprep.subr.bf16.mxu1 %v3900_v18 }
 0xfee   : > { %v3799_v24 = vpop.permute.xlu0 %3798 }
 0xfef   : > { %v3801_v17 = vunpack.i.h.bf16 %v3799_v24  ;;  %v3800_v15 = vunpack.i.l.bf16 %v3799_v24  ;;  %v759_v24 = vld [vmem:[%s4653_s18 + $0x8] sm:$0xff] }
 0xff1   : > { %v2613_v19 = vsel %vm857_vm2, %v3800_v15, %v3790_v14  ;;  %v2614_v20 = vsel %vm857_vm2, %v3801_v17, %v3791_v25  ;;  %v3657_v25 = vpack.c.bf16 %v759_v24, %v758_v23  ;;  %v3324_v14 = vld [vmem:[%s4649_s14] ss:$0 sm:$0xff] }
 0xff2   : > { %v2619_v29 = vpack.c.bf16 %v2614_v20, %v2613_v19 }
 0xff4   : > { %3545 = vmatpush3.bf16.msra.mxu1 %v2619_v29 }
 0xff5   : > { %3546 = vmatprep.subr.bf16.mxu1 %v3900_v18 }
 0xff6   : > { %v3804_v37 = vpop.permute.xlu0 %3803 }
 0xff7   : > { %v3806_v41 = vunpack.i.h.bf16 %v3804_v37  ;;  %v3805_v43 = vunpack.i.l.bf16 %v3804_v37 }
 0xff9   : > { %v2615_v7 = vsel %vm857_vm2, %v3805_v43, %v3810_v49  ;;  %v2616_v44 = vsel %vm857_vm2, %v3806_v41, %v3811_v13  ;;  %v760_v49 = vld [vmem:[%s4653_s18 + $0x10] sm:$0xff]  ;;  %v761_v41 = vld [vmem:[%s4653_s18 + $0x18] sm:$0xff] }
 0xffa   : > { %v2620_v11 = vpack.c.bf16 %v2616_v44, %v2615_v7  ;;  %v3661_v43 = vpack.c.bf16 %v761_v41, %v760_v49  ;;  %v3329_v7 = vld [vmem:[%s4652_s17] ss:$0 sm:$0xff] }
 0xffc   : > { %3547 = vmatpush3.bf16.msra.mxu1 %v2620_v11 }
 0xffd   : > { %3646 = vmatprep.subr.bf16.mxu1 %v3645_v35 }
 0xfff   : > { %3549 = vmatmul.mubr.msk.bf16.vlgmr.msra.gmra.mrb[32].mxu1 %vm1445_vm15, %v4241_v62 }
0x1000   : > { %3574 = vmatprep.mubr.msk.f32.mxu1 %vm769_vm0, %v3890_v1  ;;  %3648 = vmatpush3.bf16.msra.mxu1 %v3645_v35 }
0x1007   : > { %3575 = vmatmul.mubr.msk.f32.vlgmr.msra.gmra.mrb[36].mxu1 %vm769_vm0, %v3891_v60 }
0x10d2   : > { %v2655_v34 = vpop.f32.mrb[32].mxu1 }
0x10d3   : > { %v2662_v32 = vmax.f32 %v2655_v34, 1e-30  ;;  %v3550_v52 = vpop.f32.mrb[33].mxu1 }
0x10d4   : > { %v2658_v39 = vpop.f32.mrb[34].mxu1 }
0x10d5   : > { %3874 = vrcp.f32 %v2662_v32  ;;  %v2663_v62 = vmax.f32 %v2658_v39, 1e-30  ;;  %v3551_v36 = vpop.f32.mrb[35].mxu1 }
0x10d7   : > { %3876 = vrcp.f32 %v2663_v62 }
0x10df   : > { %v3875_v54 = vpop.eup %3874 }
0x10e0   : > { %2668 = vperm.xlu0 %3812, %v3875_v54  }
0x10e1   : > { %v3877_v56 = vpop.eup %3876 }
0x10e2   : > { %2673 = vperm.xlu1 %3813, %v3877_v56  }
0x115f   : > { %v2669_v61 = vpop.permute.xlu0 %2668 }
0x1160   : > { %v2676_v0 = vmul.f32 %v2669_v61, %v2655_v34 }
0x1161   : > { %v2674_v28 = vpop.permute.xlu1 %2673 }
0x1162   : > { %v2678_v6 = vadd.f32 %v2676_v0, %v4456_v48  ;;  %v2677_v2 = vmul.f32 %v2674_v28, %v2658_v39  ;;  %v751_v48 = vld [vmem:[%s4650_s15] sm:$0xff] }
0x1163   : > { %v701_v39 = vld [vmem:[%s678_s27] sm:$0x1] }
0x1164   : > { %v2686_v9 = vadd.f32 %v3319_v46, %v2678_v6  ;;  %v2679_v47 = vadd.f32 %v2677_v2, %v4458_v5  ;;  %v753_v5 = vld [vmem:[%s4650_s15 + $0x10] sm:$0xff] }
0x1165   : > { %v3653_v22 = vpack.c.bf16 %v754_v55, %v753_v5 }
0x1166   : > { %vm2688_vm13 = vcmp.gt.f32.partialorder %v2686_v9, 0.0  ;;  %v2690_v3 = vmul.f32 0.2, %v2686_v9  ;;  %v2687_v8 = vadd.f32 %v3319_v46, %v2679_v47 }
0x1168   : > { %vm2689_vm15 = vcmp.gt.f32.partialorder %v2687_v8, 0.0  ;;  %v2691_v12 = vmul.f32 0.2, %v2687_v8  ;;  %v2692_v16 = vsel %vm2688_vm13, %v2686_v9, %v2690_v3 }
0x1169   : > { %v2694_v21 = vadd.f32 %v2692_v16, %v4069_v26  ;;  %v752_v26 = vld [vmem:[%s4650_s15 + $0x8] sm:$0xff] }
0x116a   : > { %v2693_v51 = vsel %vm2689_vm15, %v2687_v8, %v2691_v12 }
0x116b   : > { %v2695_v59 = vadd.f32 %v2693_v51, %v4074_v27  ;;  %v2696_v10 = vmax.f32 %v2694_v21, 0.0  ;;  %v3649_v27 = vpack.c.bf16 %v752_v26, %v751_v48 }
0x116d   : > { %v2697_v4 = vmax.f32 %v2695_v59, 0.0  ;;  %3560 = vmatprep.mubr.msk.f32.mxu0 %vm857_vm2, %v2696_v10  ;;  %3650 = vmatprep.subr.bf16.mxu1 %v3649_v27 }
0x116e   : > { %3652 = vmatpush3.bf16.msra.mxu1 %v3649_v27 }
0x116f   : > { %3561 = vmatmul.mubr.msk.f32.vlgmr.msra.gmra.mrb[30].mxu0 %vm857_vm2, %v2697_v4  ;;  %3654 = vmatprep.subr.bf16.mxu1 %v3653_v22 }
0x1170   : > { %3644 = vmatpush3.bf16.msra.mxu0 %v3641_v57  ;;  %3567 = vmatprep.mubr.msk.f32.mxu0 %vm769_vm0, %v3890_v1 }
0x1171   : > { %3658 = vmatprep.subr.bf16.mxu0 %v3657_v25 }
0x1172   : > { %3656 = vmatpush3.bf16.msra.mxu1 %v3653_v22 }
0x1173   : > { %3599 = vmatprep.subr.bf16.mxu1 %v3900_v18 }
0x1177   : > { %3568 = vmatmul.mubr.msk.f32.vlgmr.msra.gmra.mrb[30].mxu0 %vm769_vm0, %v3891_v60 }
0x1178   : > { %3660 = vmatpush3.bf16.msra.mxu0 %v3657_v25 }
0x1179   : > { %3662 = vmatprep.subr.bf16.mxu0 %v3661_v43 }
0x117c   : > { %3664 = vmatpush3.bf16.msra.mxu0 %v3661_v43 }
0x124a   : > { %v3569_v17 = vpop.f32.mrb[30].mxu0 }
0x124b   : > { %v2861_v15 = vadd.f32 %v3569_v17, %v3324_v14  ;;  %v2845_v19 = vpop.f32.mrb[31].mxu0 }
0x124c   : > { %v2860_v20 = vadd.f32 %v3324_v14, %v2845_v19 }
0x124d   : > { %v2865_v29 = vmul.f32 0.2, %v2861_v15  ;;  %vm2863_vm12 = vcmp.gt.f32.partialorder %v2861_v15, 0.0 }
0x124e   : > { %vm2862_vm1 = vcmp.gt.f32.partialorder %v2860_v20, 0.0  ;;  %v2864_v40 = vmul.f32 0.2, %v2860_v20 }
0x124f   : > { %v2867_v13 = vsel %vm2863_vm12, %v2861_v15, %v2865_v29 }
0x1250   : > { %v2866_v37 = vsel %vm2862_vm1, %v2860_v20, %v2864_v40 }
0x1251   : > { %3585 = vmatprep.mubr.msk.f32.mxu1 %vm857_vm2, %v2866_v37 }
0x1252   : > { %3586 = vmatmul.mubr.msk.f32.vlgmr.msra.gmra.mrb[36].mxu1 %vm857_vm2, %v2867_v13 }
0x1253   : > { %3601 = vmatprep.mubr.msk.bf16.mxu1 %vm3905_vm14, %v3900_v18  ;;  %vm3163_vm14 = vcmask 0  }
0x1325   : > { %v3587_v44 = vpop.f32.mrb[36].mxu1 }
0x1326   : > { %v3015_v11 = vpop.f32.mrb[37].mxu1  ;;  %v3031_v1 = vadd.f32 %v3587_v44, %v3329_v7 }
0x1327   : > { %v3030_v18 = vadd.f32 %v3329_v7, %v3015_v11 }
0x1329   : > { %3596 = vmatprep.mubr.msk.f32.mxu0 %vm857_vm2, %v3030_v18 }
0x132a   : > { %3597 = vmatmul.mubr.msk.f32.vlgmr.msra.gmra.mrb[40].mxu0 %vm857_vm2, %v3031_v1 }
0x13fd   : > { %v3598_v42 = vpop.f32.mrb[40].mxu0 }
0x13fe   : > { %v3116_v30 = vadd.f32 %v3598_v42, %v3330_v38  ;;  %v3110_v34 = vpop.f32.mrb[41].mxu0 }
0x13ff   : > { %v3111_v32 = vadd.f32 %v3330_v38, %v3110_v34 }
0x1401   : > { %v3119_v52 = vpack.c.bf16 %v3116_v30, %v3111_v32 }
0x1403   : > { %3600 = vmatpush3.bf16.msra.mxu1 %v3119_v52 }
0x1406   : > { %3602 = vmatmul.mubr.msk.bf16.vlgmr.msra.gmra.mrb[40].mxu1 %vm769_vm0, %v701_v39 }
0x14d9   : > { %v3157_v62 = vpop.f32.mrb[40].mxu1 }
0x14da   : > { %3164 = vst.msk [vmem:[%s681_s22] sm:$0x1] %vm3163_vm14, %v3157_v62  ;;  %v3603_v36 = vpop.f32.mrb[41].mxu1 }
0x14db   : > { %v3160_v54 = vpop.f32.mrb[42].mxu1 }
0x14dc   : > { %v3604_v56 = vpop.f32.mrb[43].mxu1 }
0x14dd PF: > { %s32_s23 = sadd.s32 1, %s3898_s23  }
0x14de   : > { %p29_p4 = scmp.ge.s32.totalorder %s32_s23, 4  }
0x14e0   :  { %31 = sbr.rel (!%p29_p4) target bundleno = 6 (0x6), region = 139 }

</bundles_post_ra>
